<compile_context>
chip_gen: v5e
topology: v5e:2x2
jax: 0.10.0
libtpu: 0.0.40
codegen_flags: <defaults>
</compile_context>

<pallas_src>
import functools

import jax
import jax.numpy as jnp
from jax.experimental import pallas as pl
from jax.experimental.pallas import tpu as pltpu


# ----------------------------------------------------------------------------
# In-kernel math helpers (pure jnp, used inside Pallas kernel bodies)
# ----------------------------------------------------------------------------
def _sigmoid(x):
    return 1.0 / (1.0 + jnp.exp(-x))


def _softmax_lastdim(x):
    m = jnp.max(x, axis=-1, keepdims=True)
    e = jnp.exp(x - m)
    return e / jnp.sum(e, axis=-1, keepdims=True)


def _apply_act(y, act):
    if act == "relu":
        return jnp.maximum(y, 0.0)
    if act == "sigmoid":
        return _sigmoid(y)
    if act == "softmax":
        return _softmax_lastdim(y)
    return y


# ----------------------------------------------------------------------------
# Kernel 1: (M,K)-tiled matmul with fused bias + activation (im2col convs)
#           bf16 operands, f32 accumulation on the MXU.
# ----------------------------------------------------------------------------
def _matmul_simple_kernel(a_ref, b_ref, bias_ref, o_ref, *, act):
    y = jnp.dot(a_ref[...], b_ref[...],
                preferred_element_type=jnp.float32) + bias_ref[...]
    o_ref[...] = _apply_act(y, act)


def _matmul_acc_kernel(a_ref, b_ref, bias_ref, o_ref, acc_ref, *, act):
    k = pl.program_id(1)

    @pl.when(k == 0)
    def _():
        acc_ref[...] = jnp.zeros_like(acc_ref)

    acc_ref[...] += jnp.dot(a_ref[...], b_ref[...],
                            preferred_element_type=jnp.float32)

    @pl.when(k == pl.num_programs(1) - 1)
    def _():
        o_ref[...] = _apply_act(acc_ref[...] + bias_ref[...], act)


def _choose_tk(K, max_tk=2560):
    # v5e-safe K tile (<= 2304 for the 20736-deep primary-caps contraction).
    if K <= max_tk or K % 128 != 0:
        return K
    for d in range(max_tk // 128, 0, -1):
        if K % (d * 128) == 0:
            return d * 128
    return K


def _pick_tm(M, target=2):
    # Split M in `target` parallel blocks when cleanly possible (megacore).
    if M % target == 0 and (M // target) % 8 == 0:
        return M // target
    return M


def pallas_linear(a, w, bias, act="none", tm=None):
    """act( a @ w + bias ) with a: [M,K], w: [K,N], bias: [N]."""
    M, K = a.shape
    K2, N = w.shape
    assert K == K2
    tk = _choose_tk(K)
    kt = K // tk
    if tm is None or M % tm != 0 or (tm % 8 != 0 and tm != M):
        tm = M
    mt = M // tm
    bias2 = bias.reshape(1, N).astype(jnp.float32)
    a = a.astype(jnp.bfloat16)
    w = w.astype(jnp.bfloat16)

    if kt == 1:
        kernel = functools.partial(_matmul_simple_kernel, act=act)
        scratch = []
    else:
        kernel = functools.partial(_matmul_acc_kernel, act=act)
        scratch = [pltpu.VMEM((tm, N), jnp.float32)]

    return pl.pallas_call(
        kernel,
        out_shape=jax.ShapeDtypeStruct((M, N), jnp.float32),
        grid_spec=pltpu.PrefetchScalarGridSpec(
            num_scalar_prefetch=0,
            grid=(mt, kt),
            in_specs=[
                pl.BlockSpec((tm, tk), lambda i, k: (i, k)),
                pl.BlockSpec((tk, N), lambda i, k: (k, 0)),
                pl.BlockSpec((1, N), lambda i, k: (0, 0)),
            ],
            out_specs=pl.BlockSpec((tm, N), lambda i, k: (i, 0)),
            scratch_shapes=scratch,
        ),
        compiler_params=pltpu.CompilerParams(
            dimension_semantics=("parallel", "arbitrary")),
    )(a, w, bias2)


# ----------------------------------------------------------------------------
# Kernel 2: fused primary-caps squash + x_hat + dynamic routing
#   x_ref : [1, K, I]  f32  (un-squashed primary caps, capsule dim K on sublanes)
#   w_ref : [K, J, O, I] bf16  (DenseCapsule weight, lane-dense over I)
#   v_ref : [1, J, O]  f32  (routed digit capsules)
#   xhat  : [1, J, O, I] f32 VMEM scratch (never leaves VMEM)
# ----------------------------------------------------------------------------
def _capsule_kernel(x_ref, w_ref, v_ref, xhat_ref, *, routings):
    x = x_ref[...]                                     # [1, K, I]
    B, K, I = x.shape
    J, O = w_ref.shape[1], w_ref.shape[2]

    # squash over the capsule (K) axis -- fused, no standalone kernel
    n2 = jnp.sum(x * x, axis=1, keepdims=True)         # [1, 1, I]
    nrm = jnp.sqrt(n2)
    xs = (n2 / (1.0 + n2) / (nrm + 1e-8)) * x          # [1, K, I]

    # prediction vectors: xhat[b,j,o,i] = sum_k W[k,j,o,i] * xs[b,k,i]
    for k in range(K):
        wk = w_ref[k].astype(jnp.float32)              # [J, O, I]
        xk = xs[:, k, :]                               # [1, I]
        contrib = wk[None, :, :, :] * xk[:, None, None, :]
        if k == 0:
            xhat_ref[...] = contrib
        else:
            xhat_ref[...] += contrib

    xhat = xhat_ref[...]                               # [1, J, O, I]

    # dynamic routing (softmax over the out-capsule axis J, unrolled over J)
    b_log = jnp.zeros((B, J, 1, I), jnp.float32)
    v = jnp.zeros((B, J, O), jnp.float32)
    for r in range(routings):
        m = b_log[:, 0]                                # [1, 1, I]
        for j in range(1, J):
            m = jnp.maximum(m, b_log[:, j])
        e = jnp.exp(b_log - m[:, None, :, :])          # [1, J, 1, I]
        z = e[:, 0]
        for j in range(1, J):
            z = z + e[:, j]
        c = e / z[:, None, :, :]                       # [1, J, 1, I]

        s = jnp.sum(c * xhat, axis=3)                  # [1, J, O]  (lane reduce)
        sn2 = jnp.sum(s * s, axis=-1, keepdims=True)
        sn = jnp.sqrt(sn2)
        v = (sn2 / (1.0 + sn2) / (sn + 1e-8)) * s      # squash over O

        if r < routings - 1:
            b_log = b_log + jnp.sum(v[:, :, :, None] * xhat,
                                    axis=2, keepdims=True)   # [1, J, 1, I]

    v_ref[...] = v


def pallas_capsule(xT, w_kjoi, routings):
    B, K, I = xT.shape
    Kw, J, O, Iw = w_kjoi.shape
    assert K == Kw and I == Iw
    return pl.pallas_call(
        functools.partial(_capsule_kernel, routings=routings),
        out_shape=jax.ShapeDtypeStruct((B, J, O), jnp.float32),
        grid_spec=pltpu.PrefetchScalarGridSpec(
            num_scalar_prefetch=0,
            grid=(B,),
            in_specs=[
                pl.BlockSpec((1, K, I), lambda b: (b, 0, 0)),
                pl.BlockSpec((K, J, O, I), lambda b: (0, 0, 0, 0)),
            ],
            out_specs=pl.BlockSpec((1, J, O), lambda b: (b, 0, 0)),
            scratch_shapes=[pltpu.VMEM((1, J, O, I), jnp.float32)],
        ),
        compiler_params=pltpu.CompilerParams(
            dimension_semantics=("parallel",),
            vmem_limit_bytes=32 * 1024 * 1024),
    )(xT.astype(jnp.float32), w_kjoi)


# ----------------------------------------------------------------------------
# Kernel 3: fused epilogue heads -- decoder (128->512->1024->C*H*W, sigmoid),
#           class prediction (softmax), 8 attribute sigmoids, and capsule-wise
#           euclidean distances to the prototype vectors.
# ----------------------------------------------------------------------------
def _heads_kernel(v_ref, flat_ref,
                  w1_ref, b1_ref, w2_ref, b2_ref, w3_ref, b3_ref,
                  pw_ref, pb_ref, aw_ref, ab_ref, protos_ref,
                  rec_ref, pred_ref, attr_ref, dist_ref):
    flat = flat_ref[...]                                # [B, 128] f32
    fb = flat.astype(jnp.bfloat16)

    # decoder
    h1 = jnp.dot(fb, w1_ref[...],
                 preferred_element_type=jnp.float32) + b1_ref[...]
    h1 = jnp.maximum(h1, 0.0)
    h2 = jnp.dot(h1.astype(jnp.bfloat16), w2_ref[...],
                 preferred_element_type=jnp.float32) + b2_ref[...]
    h2 = jnp.maximum(h2, 0.0)
    h3 = jnp.dot(h2.astype(jnp.bfloat16), w3_ref[...],
                 preferred_element_type=jnp.float32) + b3_ref[...]
    rec_ref[...] = _sigmoid(h3)

    # class prediction head (softmax)
    logits = jnp.dot(flat, pw_ref[...],
                     preferred_element_type=jnp.float32) + pb_ref[...]
    pred_ref[...] = _softmax_lastdim(logits)

    # 8 attribute heads: sigmoid(v[:, j, :] @ w_j + b_j)
    v = v_ref[...]                                      # [B, J, O]
    attr_ref[...] = _sigmoid(
        jnp.sum(v * aw_ref[...][None, :, :], axis=-1) + ab_ref[...])

    # capsule-wise distances to (zero-padded, stacked) prototype vectors
    protos = protos_ref[...]                            # [J, Cmax*P, O]
    d = v[:, :, None, :] - protos[None, :, :, :]        # [B, J, Cmax*P, O]
    dist_ref[...] = jnp.sqrt(jnp.sum(d * d, axis=-1))   # [B, J, Cmax*P]


def pallas_heads(v, flat, params):
    B, J, O = v.shape
    npix = params["dec_b3"].shape[0]
    ncls = params["pred_b"].shape[0]
    CP = params["protos_stack"].shape[1]
    return pl.pallas_call(
        _heads_kernel,
        out_shape=(
            jax.ShapeDtypeStruct((B, npix), jnp.float32),
            jax.ShapeDtypeStruct((B, ncls), jnp.float32),
            jax.ShapeDtypeStruct((B, J), jnp.float32),
            jax.ShapeDtypeStruct((B, J, CP), jnp.float32),
        ),
    )(v.astype(jnp.float32), flat.astype(jnp.float32),
      params["dec_w1"], params["dec_b1"].reshape(1, -1).astype(jnp.float32),
      params["dec_w2"], params["dec_b2"].reshape(1, -1).astype(jnp.float32),
      params["dec_w3"], params["dec_b3"].reshape(1, -1).astype(jnp.float32),
      params["pred_w"].astype(jnp.float32),
      params["pred_b"].reshape(1, -1).astype(jnp.float32),
      params["attr_w"].astype(jnp.float32),
      params["attr_b"].reshape(1, -1).astype(jnp.float32),
      params["protos_stack"].astype(jnp.float32))


# ----------------------------------------------------------------------------
# Plain-JAX glue: im2col patch extraction (NHWC)
# ----------------------------------------------------------------------------
def im2col_nhwc(x, k, stride):
    B, H, W, C = x.shape
    oh = (H - k) // stride + 1
    ow = (W - k) // stride + 1
    cols = []
    for i in range(k):
        for j in range(k):
            cols.append(x[:, i:i + stride * (oh - 1) + 1:stride,
                          j:j + stride * (ow - 1) + 1:stride, :])
    patches = jnp.stack(cols, axis=3)              # [B, oh, ow, k*k, C]
    return patches.reshape(B * oh * ow, k * k * C), oh, ow


# ----------------------------------------------------------------------------
# Parameter init (deterministic, shapes match the PyTorch module)
# ----------------------------------------------------------------------------
def init_params(key, input_size=(1, 32, 32), numcaps=8, out_dim_caps=16,
                num_protos=4, numclasses=5):
    C, H, W = input_size
    ks = list(jax.random.split(key, 32))
    it = iter(ks)
    nxt = lambda: next(it)
    p = {}

    # conv1: Conv2d(C, 256, k=9, s=1)  weight [256,C,9,9] -> [81*C, 256],
    # contraction dim zero-padded up to a multiple of 128, stored bf16.
    w = jax.random.normal(nxt(), (256, C, 9, 9), jnp.float32) * 0.05
    w = w.transpose(2, 3, 1, 0).reshape(9 * 9 * C, 256)
    kpad = (-w.shape[0]) % 128
    p["conv1_w"] = jnp.pad(w, ((0, kpad), (0, 0))).astype(jnp.bfloat16)
    p["conv1_b"] = jax.random.normal(nxt(), (256,), jnp.float32) * 0.05

    # primary caps conv: Conv2d(256, 256, k=9, s=2) -> [81*256, 256], bf16
    w = jax.random.normal(nxt(), (256, 256, 9, 9), jnp.float32) * 0.02
    p["pc_w"] = w.transpose(2, 3, 1, 0).reshape(9 * 9 * 256, 256).astype(jnp.bfloat16)
    p["pc_b"] = jax.random.normal(nxt(), (256,), jnp.float32) * 0.02

    # DenseCapsule weight: torch layout [J, I, O, K] -> lane-dense [K, J, O, I], bf16
    in_num_caps = 32 * 8 * 8
    wd = 0.01 * jax.random.normal(
        nxt(), (numcaps, in_num_caps, out_dim_caps, 8), jnp.float32)
    p["digit_w"] = jnp.transpose(wd, (3, 0, 2, 1)).astype(jnp.bfloat16)

    # decoder: 128 -> 512 -> 1024 -> C*H*W (sigmoid), weights bf16
    d_in = numcaps * out_dim_caps
    p["dec_w1"] = (jax.random.normal(nxt(), (d_in, 512), jnp.float32) * 0.05).astype(jnp.bfloat16)
    p["dec_b1"] = jax.random.normal(nxt(), (512,), jnp.float32) * 0.05
    p["dec_w2"] = (jax.random.normal(nxt(), (512, 1024), jnp.float32) * 0.03).astype(jnp.bfloat16)
    p["dec_b2"] = jax.random.normal(nxt(), (1024,), jnp.float32) * 0.03
    p["dec_w3"] = (jax.random.normal(nxt(), (1024, C * H * W), jnp.float32) * 0.03).astype(jnp.bfloat16)
    p["dec_b3"] = jax.random.normal(nxt(), (C * H * W,), jnp.float32) * 0.03

    # predOutLayers: Linear(128, 5) + softmax
    p["pred_w"] = jax.random.normal(nxt(), (d_in, numclasses), jnp.float32) * 0.05
    p["pred_b"] = jax.random.normal(nxt(), (numclasses,), jnp.float32) * 0.05

    # 8 attrOutLayers: each Linear(out_dim_caps, 1) + sigmoid (stacked)
    p["attr_w"] = jax.random.normal(nxt(), (8, out_dim_caps), jnp.float32) * 0.1
    p["attr_b"] = jax.random.normal(nxt(), (8,), jnp.float32) * 0.1

    # prototype digits (torch.rand -> uniform [0,1)), stacked with zero padding
    ncls_per_attr = [5, 4, 6, 5, 5, 5, 5, 5]
    protos = [jax.random.uniform(nxt(), (nc, num_protos, out_dim_caps), jnp.float32)
              for nc in ncls_per_attr]
    cmax = max(ncls_per_attr)
    protos_pad = jnp.stack(
        [jnp.pad(pr, ((0, cmax - pr.shape[0]), (0, 0), (0, 0))) for pr in protos])
    p["protos_stack"] = protos_pad.reshape(len(ncls_per_attr),
                                           cmax * num_protos, out_dim_caps)
    p["protos_ncls"] = ncls_per_attr
    p["num_protos"] = num_protos
    return p


# ----------------------------------------------------------------------------
# Forward pass (mirrors ProtoCapsNet.forward, threeD=False)
# ----------------------------------------------------------------------------
def proto_capsnet_forward(x_nchw, params, input_size=(1, 32, 32), routings=3):
    B = x_nchw.shape[0]
    x = jnp.transpose(x_nchw, (0, 2, 3, 1)).astype(jnp.float32)    # NHWC

    # conv1 + ReLU (im2col, K padded 81 -> 128, M tiled for megacore)
    cols, oh, ow = im2col_nhwc(x, 9, 1)
    kpad = params["conv1_w"].shape[0] - cols.shape[1]
    cols = jnp.pad(cols, ((0, 0), (0, kpad)))
    y = pallas_linear(cols, params["conv1_w"], params["conv1_b"],
                      act="relu", tm=_pick_tm(cols.shape[0]))
    y = y.reshape(B, oh, ow, 256)

    # PrimaryCapsule conv (k=9, s=2); .view(B, -1, 8) in NCHW order
    cols2, oh2, ow2 = im2col_nhwc(y, 9, 2)
    y2 = pallas_linear(cols2, params["pc_w"], params["pc_b"], act="none")
    y2 = y2.reshape(B, oh2, ow2, 256).transpose(0, 3, 1, 2)         # NCHW
    caps = y2.reshape(B, -1, 8)                                     # [B, 2048, 8]
    xT = jnp.transpose(caps, (0, 2, 1))                             # [B, 8, 2048]

    # fused squash + prediction vectors + dynamic routing (digitcaps)
    v = pallas_capsule(xT, params["digit_w"], routings)             # [B, 8, 16]

    # fused epilogue: decoder + class pred + attribute heads + proto distances
    flat = v.reshape(B, -1)                                         # [B, 128]
    rec_flat, pred, pred_attr, dist_all = pallas_heads(v, flat, params)
    rec = rec_flat.reshape(B, *input_size)

    P = params["num_protos"]
    dists = [dist_all[:, j, :n * P].reshape(B, n, P)
             for j, n in enumerate(params["protos_ncls"])]

    return pred, pred_attr, rec, dists


# ----------------------------------------------------------------------------
# Main
# ----------------------------------------------------------------------------
if __name__ == "__main__":
    input_size = (1, 32, 32)      # (C, H, W) -> primary caps 32*8*8 = 2048 caps
    numcaps, out_dim_caps, routings, num_protos = 8, 16, 3, 4
    batch = 2

    key = jax.random.PRNGKey(0)
    k_params, k_x = jax.random.split(key)
    params = init_params(k_params, input_size=input_size, numcaps=numcaps,
                         out_dim_caps=out_dim_caps, num_protos=num_protos)
    x = jax.random.normal(k_x, (batch, *input_size), jnp.float32)   # NCHW

    out = proto_capsnet_forward(x, params, input_size=input_size,
                                routings=routings)
    out = jax.block_until_ready(out)

    pred, pred_attr, rec, dists = out
    assert pred.shape == (batch, 5)
    assert pred_attr.shape == (batch, 8)
    assert rec.shape == (batch, *input_size)
    assert len(dists) == 8 and dists[2].shape == (batch, 6, num_protos)
    assert all(bool(jnp.all(jnp.isfinite(d))) for d in dists)
    print("KERNEL_OK")
</pallas_src>

<mosaic_0001>
module attributes {stable_mosaic.version = 11 : i64} {
  func.func @_matmul_simple_kernel(%arg0: i32, %arg1: i32, %arg2: memref<576x128xbf16, #tpu.memory_space<vmem>>, %arg3: memref<128x256xbf16, #tpu.memory_space<vmem>>, %arg4: memref<1x256xf32, #tpu.memory_space<vmem>>, %arg5: memref<576x256xf32, #tpu.memory_space<vmem>>) attributes {dimension_semantics = [#tpu.dimension_semantics<parallel>, #tpu.dimension_semantics<arbitrary>], iteration_bounds = array<i64: 2, 1>, scalar_prefetch = 0 : i64, scratch_operands = 0 : i64, tpu.core_type = #tpu.core_type<tc>, window_params = [{transform_indices = @transform_0, window_bounds = array<i64: 576, 128>}, {transform_indices = @transform_1, window_bounds = array<i64: 128, 256>}, {pipeline_mode = #tpu.pipeline_mode<synchronous>, transform_indices = @transform_2, window_bounds = array<i64: 1, 256>}, {transform_indices = @transform_3, window_bounds = array<i64: 576, 256>}]} {
    %c0 = arith.constant 0 : index
    %c0_0 = arith.constant 0 : index
    %0 = vector.load %arg2[%c0, %c0_0] : memref<576x128xbf16, #tpu.memory_space<vmem>>, vector<576x128xbf16>
    %c0_1 = arith.constant 0 : index
    %c0_2 = arith.constant 0 : index
    %1 = vector.load %arg3[%c0_1, %c0_2] : memref<128x256xbf16, #tpu.memory_space<vmem>>, vector<128x256xbf16>
    %cst = arith.constant dense<0.000000e+00> : vector<576x256xf32>
    %2 = tpu.matmul %0, %1, %cst {dimension_numbers = #tpu.dot_dimension_numbers<[1], [0], [0], [1], [0, 0, 1, 1], [], []>} : vector<576x128xbf16>, vector<128x256xbf16>, vector<576x256xf32> -> vector<576x256xf32>
    %c0_3 = arith.constant 0 : index
    %c0_4 = arith.constant 0 : index
    %3 = vector.load %arg4[%c0_3, %c0_4] : memref<1x256xf32, #tpu.memory_space<vmem>>, vector<1x256xf32>
    %4 = vector.broadcast %3 : vector<1x256xf32> to vector<576x256xf32>
    %5 = arith.addf %2, %4 : vector<576x256xf32>
    %cst_5 = arith.constant 0.000000e+00 : f32
    %6 = vector.broadcast %cst_5 : f32 to vector<576x256xf32>
    %7 = arith.maximumf %5, %6 : vector<576x256xf32>
    %c0_6 = arith.constant 0 : index
    %c0_7 = arith.constant 0 : index
    %8 = vector.load %arg5[%c0_6, %c0_7] : memref<576x256xf32, #tpu.memory_space<vmem>>, vector<576x256xf32>
    tpu.vector_store %arg5[%c0_6, %c0_7], %7 {strides = array<i32>} : memref<576x256xf32, #tpu.memory_space<vmem>>, vector<576x256xf32>,
    return
  }
  func.func @transform_0(%arg0: i32, %arg1: i32) -> (i32, i32) {
    %c0_i32 = arith.constant 0 : i32
    return %arg0, %arg1 : i32, i32
  }
  func.func @transform_1(%arg0: i32, %arg1: i32) -> (i32, i32) {
    %c0_i32 = arith.constant 0 : i32
    %c0_i32_0 = arith.constant 0 : i32
    return %arg1, %c0_i32 : i32, i32
  }
  func.func @transform_2(%arg0: i32, %arg1: i32) -> (i32, i32) {
    %c0_i32 = arith.constant 0 : i32
    %c0_i32_0 = arith.constant 0 : i32
    %c0_i32_1 = arith.constant 0 : i32
    return %c0_i32, %c0_i32_0 : i32, i32
  }
  func.func @transform_3(%arg0: i32, %arg1: i32) -> (i32, i32) {
    %c0_i32 = arith.constant 0 : i32
    %c0_i32_0 = arith.constant 0 : i32
    return %arg0, %c0_i32 : i32, i32
  }
}

</mosaic_0001>

<bundles_post_ra>
// kernel: tpu_custom_call.1
= control target key start
LH: loop header
LB: loop body
LE: loop exit
PB: predicated region body
PF: predicated region fallthrough
CT: control target
= control target key end

     0   :  { %8 = vsyncpa [#allocation3], 0  ;;  %s2498_s0 = inlined_call_operand.hbm [shape: bf16[1152,128], index: 0, kind: input, shape index: {}]   ;;  %s2499_s1 = inlined_call_operand.hbm [shape: bf16[128,256], index: 1, kind: input, shape index: {}]   ;;  %s2500_s2 = inlined_call_operand.hbm [shape: f32[1,256], index: 2, kind: input, shape index: {}]   ;;  %s2501_s3 = inlined_call_operand.hbm [shape: f32[1152,256], index: 3, kind: output, shape index: {}]  }
   0x1   :  { %10 = vsyncpa [#allocation3 + $0x1], 0 }
   0x2   :  { %11 = vsyncpa [#allocation6], 0 }
   0x3   :  { %12 = vsyncpa [#allocation4], 0 }
   0x4   :  { %14 = vsyncpa [#allocation4 + $0x1], 0  ;;  %s2018_s12 = smov 0   ;;  %s2020_s13 = smov 0  }
   0x5   :  { %s2022_s14 = smov 0   ;;  %s2024_s15 = smov 0  }
   0x6   :  { %s2026_s16 = smov 0   ;;  %s2028_s17 = smov 0  }
   0x7 LB: > { %s1426_s18 = sadd.s32 4294967295, %s1988_s17   ;;  %s1427_s19 = sadd.s32 4294967294, %s1988_s17   ;;  %s1988_s17 = sphi %s2028_s17, %s20_s17   ;;  %s1984_s16 = sphi %s2026_s16, %s2512_s16   ;;  %s1980_s15 = sphi %s2024_s15, %s2511_s15   ;;  %s1976_s14 = sphi %s2022_s14, %s2510_s14   ;;  %s1972_s13 = sphi %s2020_s13, %s2509_s13   ;;  %s1968_s12 = sphi %s2018_s12, %s2508_s12  }
   0x8   : > { %p54_p0 = scmp.ne.s32.totalorder %s1972_s13, %s1968_s12  ;;  %p2052_p1 = scmp.eq.s32.totalorder %s1426_s18, 0 }
   0x9   : > { %p2056_p2 = scmp.eq.s32.totalorder %s1426_s18, 1  ;;  %p131_p3 = scmp.eq.s32.totalorder %s1427_s19, 1 }
   0xa   : > { %p2062_p4 = por %p2052_p1, %p54_p0  ;;  %p1428_p5 = scmp.ge.s32.totalorder %s1988_s17, 1 }
   0xb   : > { %p2067_p6 = por %p131_p3, %p54_p0  ;;  %p138_p7 = scmp.lt.s32.totalorder %s1988_s17, 3 }
   0xc   : > { %s153_s26 = sshll.u32 %s2499_s1, 4  ;;  %s1990_s28 = smov [#allocation5]   ;;  %s154_s26 = int_to_ptr.hbm [resolvable:$true] %s153_s26 }
   0xd   : > { %p2075_p8 = pnand %p1428_p5, %p138_p7  ;;  %s155_s29 = sshll.u32 %s1990_s28, 4  ;;  %s156_s29 = int_to_ptr.vmem [resolvable:$true] %s155_s29 }
   0xe   : > { %p1431_p11 = scmp.ge.s32.totalorder %s1988_s17, 2  ;;  %s168_s5 = sshll.u32 %s2500_s2, 4  ;;  %s169_s5 = int_to_ptr.hbm [resolvable:$true] %s168_s5 }
   0xf   : > { %p1735_p9 = pneg %p2075_p8  ;;  %s1991_s6 = smov 128  }
  0x10   : > { %s1992_s7 = smov 8   ;;  %s1993_s8 = smov [#allocation7]  }
  0x11   : > { %p1736_p10 = pnand %p1735_p9, %p2052_p1  ;;  %s170_s9 = sshll.u32 %s1993_s8, 4  ;;  %s171_s9 = int_to_ptr.vmem [resolvable:$true] %s170_s9 }
  0x12   : > { %s32_s10 = sadd.s32 1, %s1984_s16  ;;  %s41_s11 = sadd.s32 1, %s1976_s14 }
  0x13   : > { %1738 = dma.hbm_to_vmem [thread:$0]  (!%p1736_p10), %s154_s26, 2048, %s156_s29, [#allocation6], %s1991_s6, %s1991_s6, %s1992_s7  }
  0x14   : > { %1741 = dma.hbm_to_vmem [thread:$0]  (!%p1736_p10), %s169_s5, 32, %s171_s9, [#allocation6]  }
  0x15   : > { %p34_p12 = scmp.ge.s32.totalorder %s32_s10, 2  ;;  %p48_p13 = scmp.ne.s32.totalorder %s1976_s14, %s1972_s13 }
  0x16   : > { %p49_p0 = scmp.eq.s32.totalorder %s1988_s17, 0  ;;  %p1752_p3 = scmp.lt.s32.totalorder %s1988_s17, 2 }
  0x17   : > { %s2514_s10 = smov (%p34_p12, %s32_s10), 0  ;;  %p2097_p7 = por %p2056_p2, %p48_p13 }
  0x18   : > { %p50_p5 = por %p49_p0, %p48_p13  ;;  %s36_s19 = ssub.s32 %s1984_s16, %s2514_s10 }
  0x19   : > { %s181_s24 = sand.u32 1, %s1976_s14   ;;  %p39_p9 = scmp.eq.s32.totalorder %s36_s19, 0 }
  0x1a   : > { %s1720_s25 = smul.u32 288, %s181_s24  ;;  %p1743_p10 = pnand %p1752_p3, %p50_p5 }
  0x1b   : > { %s2105_s26 = scalar_select %p39_p9, %s1976_s14, %s41_s11  }
  0x1c   : > { %s1648_s28 = smul.u32 288, %s1984_s16  ;;  %s185_s29 = scalar_lea.vmem [#allocation2], %s1720_s25 }
  0x1d   : > { %s194_s30 = sshll.u32 %s185_s29, 4  ;;  %s182_s7 = scalar_lea.sflag [#allocation3], %s181_s24  ;;  %s195_s30 = int_to_ptr.vmem [resolvable:$true] %s194_s30 }
  0x1e   : > { %s191_s6 = scalar_lea.hbm %s2498_s0, %s1648_s28  ;;  %s1994_s8 = smov 64  }
  0x1f   : > { %s192_s21 = sshll.u32 %s191_s6, 4  ;;  %s1995_s9 = smov 4   ;;  %s193_s21 = int_to_ptr.hbm [resolvable:$true] %s192_s21 }
  0x20   : > { %1745 = dma.hbm_to_vmem [thread:$0]  (!%p1743_p10), %s193_s21, 4608, %s195_s30, %s182_s7, %s1994_s8, %s1994_s8, %s1995_s9  }
  0x21   : > { %206 = sbr.rel (%p2075_p8) target bundleno = 496 (0x1f0), region = 32  ;;  %s2114_s11 = sand.u32 (!%p2075_p8), 1, %s1972_s13  }
  0x22   : > { %s1721_s19 = smul.u32 (!%p2075_p8), 288, %s2114_s11  ;;  %s209_s25 = scalar_lea.sflag (!%p2075_p8), [#allocation3], %s2114_s11 }
  0x24   : > { %s2118_s29 = scalar_lea.vmem (!%p2075_p8), [#allocation2], %s1721_s19 }
  0x26   : > { %1955 = dma.done.wait (%p2062_p4), %s209_s25, 4608  }
  0x27   : > { %1957 = vsyncadd (%p2062_p4), %s209_s25, 4294962688 }
  0x28   : > { %1959 = dma.done.wait (%p2052_p1), [#allocation6], 2080  }
  0x29   : > { %1961 = vsyncadd (%p2052_p1), [#allocation6], 4294965216  ;;  %v1638_v0 = vld [vmem:[#allocation5 + $0x70] sm:$0xf]  ;;  %v1700_v1 = vld [vmem:[#allocation5 + $0x74] sm:$0xf0] }
  0x2a   : > { %v1699_v2 = vld [vmem:[#allocation5 + $0x74] sm:$0xf]  ;;  %v1639_v3 = vor.u32 %v1700_v1, %v1638_v0  ;;  %v1640_v4 = vld [vmem:[#allocation5 + $0x78] sm:$0xf0]  ;;  %v1630_v5 = vld [vmem:[#allocation5 + $0x60] sm:$0xf] }
  0x2b   : > { %v1698_v6 = vld [vmem:[#allocation5 + $0x64] sm:$0xf0]  ;;  %v1643_v7 = vor.u32 %v1699_v2, %v1640_v4  ;;  %v1697_v8 = vld [vmem:[#allocation5 + $0x64] sm:$0xf]  ;;  %v1632_v9 = vld [vmem:[#allocation5 + $0x68] sm:$0xf0] }
  0x2c   : > { %639 = vmatpush.bf16.msra.mxu0 %v1639_v3  ;;  %1704 = vmatpush.bf16.msra.mxu2 %v1639_v3  ;;  %v1631_v10 = vor.u32 %v1698_v6, %v1630_v5  ;;  %v1635_v11 = vor.u32 %v1697_v8, %v1632_v9  ;;  %v1622_v12 = vld [vmem:[#allocation5 + $0x50] sm:$0xf]  ;;  %v1696_v13 = vld [vmem:[#allocation5 + $0x54] sm:$0xf0]  ;;  %v1695_v14 = vld [vmem:[#allocation5 + $0x54] sm:$0xf] }
  0x2d   : > { %828 = vmatpush.bf16.msra.mxu1 %v1643_v7  ;;  %1712 = vmatpush.bf16.msra.mxu3 %v1643_v7  ;;  %v1624_v15 = vld [vmem:[#allocation5 + $0x58] sm:$0xf0]  ;;  %v1623_v16 = vor.u32 %v1696_v13, %v1622_v12  ;;  %v1614_v18 = vld [vmem:[#allocation5 + $0x40] sm:$0xf]  ;;  %v1694_v19 = vld [vmem:[#allocation5 + $0x44] sm:$0xf0] }
  0x2e   : > { %v1627_v17 = vor.u32 %v1695_v14, %v1624_v15  ;;  %v1693_v20 = vld [vmem:[#allocation5 + $0x44] sm:$0xf]  ;;  %v1616_v21 = vld [vmem:[#allocation5 + $0x48] sm:$0xf0]  ;;  %v1615_v22 = vor.u32 %v1694_v19, %v1614_v18  ;;  %v1606_v24 = vld [vmem:[#allocation5 + $0x30] sm:$0xf] }
  0x2f   : > { %v1619_v23 = vor.u32 %v1693_v20, %v1616_v21  ;;  %v1692_v25 = vld [vmem:[#allocation5 + $0x34] sm:$0xf0]  ;;  %v1691_v26 = vld [vmem:[#allocation5 + $0x34] sm:$0xf]  ;;  %v1608_v27 = vld [vmem:[#allocation5 + $0x38] sm:$0xf0] }
  0x30   : > { %640 = vmatpush.bf16.msra.mxu0 %v1631_v10  ;;  %1705 = vmatpush.bf16.msra.mxu2 %v1631_v10  ;;  %v1607_v28 = vor.u32 %v1692_v25, %v1606_v24  ;;  %v1611_v29 = vor.u32 %v1691_v26, %v1608_v27  ;;  %v1598_v30 = vld [vmem:[#allocation5 + $0x20] sm:$0xf]  ;;  %v1690_v31 = vld [vmem:[#allocation5 + $0x24] sm:$0xf0]  ;;  %v1689_v32 = vld [vmem:[#allocation5 + $0x24] sm:$0xf] }
  0x31   : > { %829 = vmatpush.bf16.msra.mxu1 %v1635_v11  ;;  %1713 = vmatpush.bf16.msra.mxu3 %v1635_v11  ;;  %v1600_v33 = vld [vmem:[#allocation5 + $0x28] sm:$0xf0]  ;;  %v1599_v34 = vor.u32 %v1690_v31, %v1598_v30  ;;  %v1590_v36 = vld [vmem:[#allocation5 + $0x10] sm:$0xf]  ;;  %v1688_v37 = vld [vmem:[#allocation5 + $0x14] sm:$0xf0] }
  0x32   : > { %v1603_v35 = vor.u32 %v1689_v32, %v1600_v33  ;;  %v1687_v38 = vld [vmem:[#allocation5 + $0x14] sm:$0xf]  ;;  %v1592_v39 = vld [vmem:[#allocation5 + $0x18] sm:$0xf0]  ;;  %v1591_v40 = vor.u32 %v1688_v37, %v1590_v36  ;;  %v1582_v42 = vld [vmem:[#allocation5] sm:$0xf] }
  0x33   : > { %v1595_v41 = vor.u32 %v1687_v38, %v1592_v39  ;;  %v1686_v43 = vld [vmem:[#allocation5 + $0x4] sm:$0xf0]  ;;  %v1685_v44 = vld [vmem:[#allocation5 + $0x4] sm:$0xf]  ;;  %v1584_v45 = vld [vmem:[#allocation5 + $0x8] sm:$0xf0] }
  0x34   : > { %641 = vmatpush.bf16.msra.mxu0 %v1623_v16  ;;  %1706 = vmatpush.bf16.msra.mxu2 %v1623_v16  ;;  %v1583_v46 = vor.u32 %v1686_v43, %v1582_v42  ;;  %v1587_v47 = vor.u32 %v1685_v44, %v1584_v45  ;;  %v1649_v48 = vld [vmem:[%s2118_s29] sm:$0xff]  ;;  %v1667_v49 = vld [vmem:[%s2118_s29 + $0x90] sm:$0xff]  ;;  %v1650_v50 = vld [vmem:[%s2118_s29 + $0x8] sm:$0xff]  ;;  %s1722_s20 = smul.u32 1152, %s2114_s11  ;;  %s1306_s5 = scalar_lea.sflag [#allocation4], %s2114_s11 }
  0x35   : > { %830 = vmatpush.bf16.msra.mxu1 %v1627_v17  ;;  %1714 = vmatpush.bf16.msra.mxu3 %v1627_v17  ;;  %v1668_v51 = vld [vmem:[%s2118_s29 + $0x98] sm:$0xff]  ;;  %v1651_v52 = vld [vmem:[%s2118_s29 + $0x10] sm:$0xff]  ;;  %v1669_v53 = vld [vmem:[%s2118_s29 + $0xa0] sm:$0xff]  ;;  %s1703_s27 = smul.u32 1152, %s1980_s15  ;;  %s1922_s9 = scalar_lea.hbm %s2501_s3, 2304 }
  0x36   : > { %v1652_v54 = vld [vmem:[%s2118_s29 + $0x18] sm:$0xff]  ;;  %v1670_v55 = vld [vmem:[%s2118_s29 + $0xa8] sm:$0xff]  ;;  %v1653_v56 = vld [vmem:[%s2118_s29 + $0x20] sm:$0xff]  ;;  %s2153_s22 = scalar_lea.vmem [#allocation8], %s1722_s20 }
  0x37   : > { %v1671_v57 = vld [vmem:[%s2118_s29 + $0xb0] sm:$0xff]  ;;  %v1654_v58 = vld [vmem:[%s2118_s29 + $0x28] sm:$0xff]  ;;  %v1672_v59 = vld [vmem:[%s2118_s29 + $0xb8] sm:$0xff]  ;;  %s1318_s30 = scalar_lea.hbm %s2501_s3, %s1703_s27  ;;  %s1319_s15 = sshll.u32 %s2153_s22, 4  ;;  %s1320_s15 = int_to_ptr.vmem [resolvable:$true] %s1319_s15 }
  0x38   : > { %642 = vmatpush.bf16.msra.mxu0 %v1615_v22  ;;  %1707 = vmatpush.bf16.msra.mxu2 %v1615_v22  ;;  %v1655_v60 = vld [vmem:[%s2118_s29 + $0x30] sm:$0xff]  ;;  %v1673_v61 = vld [vmem:[%s2118_s29 + $0xc0] sm:$0xff]  ;;  %v1656_v62 = vld [vmem:[%s2118_s29 + $0x38] sm:$0xff]  ;;  %s1321_s4 = sshll.u32 %s1318_s30, 4  ;;  %s1322_s4 = int_to_ptr.hbm [resolvable:$true] %s1321_s4 }
  0x39   : > { %831 = vmatpush.bf16.msra.mxu1 %v1619_v23  ;;  %1715 = vmatpush.bf16.msra.mxu3 %v1619_v23  ;;  %v1674_v63 = vld [vmem:[%s2118_s29 + $0xc8] sm:$0xff]  ;;  %v337_v0 = vld [vmem:[#allocation7] sm:$0x3]  ;;  %v1675_v4 = vld [vmem:[%s2118_s29 + $0xd0] sm:$0xff]  ;;  %s1916_s6 = sshra.s32 %s1322_s4, 4  ;;  %s1917_s6 = int_to_ptr.hbm [resolvable:$true] %s1916_s6 }
  0x3a   : > { %v2144_v1 = vperm.slane %v337_v0, 0  ;;  %v2147_v2 = vperm.slane %v337_v0, 1  ;;  %v1657_v3 = vld [vmem:[%s2118_s29 + $0x40] sm:$0xff]  ;;  %v1658_v26 = vld [vmem:[%s2118_s29 + $0x48] sm:$0xff]  ;;  %v1676_v27 = vld [vmem:[%s2118_s29 + $0xd8] sm:$0xff]  ;;  %s1918_s21 = scalar_lea.hbm %s1917_s6, 1152  ;;  %p1923_p8 = scmp.lt.s32.totalorder %s1917_s6, %s2501_s3 }
  0x3b   : > { %p1919_p1 = scmp.ne.s32.totalorder %s1917_s6, %s1918_s21  ;;  %p1924_p12 = scmp.lt.s32.totalorder %s1922_s9, %s1918_s21 }
  0x3c   : > { %643 = vmatpush.bf16.msra.mxu0 %v1607_v28  ;;  %1708 = vmatpush.bf16.msra.mxu2 %v1607_v28 }
  0x3d   : > { %832 = vmatpush.bf16.msra.mxu1 %v1611_v29  ;;  %1716 = vmatpush.bf16.msra.mxu3 %v1611_v29  ;;  %p1920_p2 = pnand %p1919_p1, %p2097_p7  ;;  %p1925_p13 = por %p1924_p12, %p1923_p8 }
  0x3f   : > { %p1921_p4 = pneg %p1920_p2 }
  0x40   : > { %644 = vmatpush.bf16.msra.mxu0 %v1599_v34  ;;  %1709 = vmatpush.bf16.msra.mxu2 %v1599_v34 }
  0x41   : > { %833 = vmatpush.bf16.msra.mxu1 %v1603_v35  ;;  %1717 = vmatpush.bf16.msra.mxu3 %v1603_v35  ;;  %p1926_p0 = pnand %p1925_p13, %p1921_p4 }
  0x44   : > { %645 = vmatpush.bf16.msra.mxu0 %v1591_v40  ;;  %1710 = vmatpush.bf16.msra.mxu2 %v1591_v40 }
  0x45   : > { %834 = vmatpush.bf16.msra.mxu1 %v1595_v41  ;;  %1718 = vmatpush.bf16.msra.mxu3 %v1595_v41 }
  0x48   : > { %646 = vmatpush.bf16.msra.mxu0 %v1583_v46  ;;  %1711 = vmatpush.bf16.msra.mxu2 %v1583_v46 }
  0x49   : > { %835 = vmatpush.bf16.msra.mxu1 %v1587_v47  ;;  %1719 = vmatpush.bf16.msra.mxu3 %v1587_v47 }
  0x4b   : > { %647 = vmatmul.bf16.vlgmr.msra.gmra.mxu0 %v1649_v48  ;;  %737 = vmatmul.bf16.vlgmr.msra.gmra.mxu2 %v1667_v49 }
  0x4c   : > { %836 = vmatmul.bf16.vlgmr.msra.gmra.mxu1 %v1649_v48  ;;  %926 = vmatmul.bf16.vlgmr.msra.gmra.mxu3 %v1667_v49 }
  0x5b   : > { %652 = vmatmul.bf16.gmra.mxu0 %v1650_v50  ;;  %742 = vmatmul.bf16.gmra.mxu2 %v1668_v51 }
  0x5c   : > { %841 = vmatmul.bf16.gmra.mxu1 %v1650_v50  ;;  %931 = vmatmul.bf16.gmra.mxu3 %v1668_v51 }
  0x6b   : > { %657 = vmatmul.bf16.gmra.mxu0 %v1651_v52  ;;  %747 = vmatmul.bf16.gmra.mxu2 %v1669_v53 }
  0x6c   : > { %846 = vmatmul.bf16.gmra.mxu1 %v1651_v52  ;;  %936 = vmatmul.bf16.gmra.mxu3 %v1669_v53  ;;  %v1659_v52 = vld [vmem:[%s2118_s29 + $0x50] sm:$0xff]  ;;  %v1677_v53 = vld [vmem:[%s2118_s29 + $0xe0] sm:$0xff] }
  0x7b   : > { %662 = vmatmul.bf16.gmra.mxu0 %v1652_v54  ;;  %752 = vmatmul.bf16.gmra.mxu2 %v1670_v55 }
  0x7c   : > { %851 = vmatmul.bf16.gmra.mxu1 %v1652_v54  ;;  %941 = vmatmul.bf16.gmra.mxu3 %v1670_v55 }
  0x8b   : > { %667 = vmatmul.bf16.gmra.mxu0 %v1653_v56  ;;  %757 = vmatmul.bf16.gmra.mxu2 %v1671_v57 }
  0x8c   : > { %856 = vmatmul.bf16.gmra.mxu1 %v1653_v56  ;;  %946 = vmatmul.bf16.gmra.mxu3 %v1671_v57 }
  0x9b   : > { %672 = vmatmul.bf16.gmra.mxu0 %v1654_v58  ;;  %762 = vmatmul.bf16.gmra.mxu2 %v1672_v59 }
  0x9c   : > { %861 = vmatmul.bf16.gmra.mxu1 %v1654_v58  ;;  %951 = vmatmul.bf16.gmra.mxu3 %v1672_v59 }
  0xab   : > { %677 = vmatmul.bf16.gmra.mxu0 %v1655_v60  ;;  %767 = vmatmul.bf16.gmra.mxu2 %v1673_v61 }
  0xac   : > { %866 = vmatmul.bf16.gmra.mxu1 %v1655_v60  ;;  %956 = vmatmul.bf16.gmra.mxu3 %v1673_v61 }
  0xbb   : > { %682 = vmatmul.bf16.gmra.mxu0 %v1656_v62  ;;  %772 = vmatmul.bf16.gmra.mxu2 %v1674_v63 }
  0xbc   : > { %871 = vmatmul.bf16.gmra.mxu1 %v1656_v62  ;;  %961 = vmatmul.bf16.gmra.mxu3 %v1674_v63 }
  0xc8   : > { %v648_v5 = vpop.f32.mrf.mxu0 }
  0xc9   : > { %v649_v6 = vadd.f32 %v648_v5, %v2144_v1  ;;  %v837_v7 = vpop.f32.mrf.mxu1 }
  0xca   : > { %v838_v8 = vadd.f32 %v837_v7, %v2147_v2 }
  0xcb   : > { %v1017_v9 = vmax.f32 %v649_v6, 0.0  ;;  %687 = vmatmul.bf16.gmra.mxu0 %v1657_v3  ;;  %777 = vmatmul.bf16.gmra.mxu2 %v1675_v4 }
  0xcc   : > { %v1018_v10 = vmax.f32 %v838_v8, 0.0  ;;  %876 = vmatmul.bf16.gmra.mxu1 %v1657_v3  ;;  %966 = vmatmul.bf16.gmra.mxu3 %v1675_v4 }
  0xcd   : > { %1161 = vst [vmem:[%s2153_s22] sm:$0xff] %v1017_v9 }
  0xce   : > { %1162 = vst [vmem:[%s2153_s22 + $0x8] sm:$0xff] %v1018_v10  ;;  %v738_v11 = vpop.f32.mrf.mxu2 }
  0xcf   : > { %v739_v12 = vadd.f32 %v738_v11, %v2144_v1  ;;  %v927_v13 = vpop.f32.mrf.mxu3 }
  0xd0   : > { %v928_v14 = vadd.f32 %v927_v13, %v2147_v2  ;;  %v650_v15 = vpop.f32.mrf.mxu0 }
  0xd1   : > { %v1089_v16 = vmax.f32 %v739_v12, 0.0  ;;  %v651_v17 = vadd.f32 %v650_v15, %v2144_v1  ;;  %v839_v18 = vpop.f32.mrf.mxu1 }
  0xd2   : > { %v1090_v19 = vmax.f32 %v928_v14, 0.0  ;;  %v840_v20 = vadd.f32 %v839_v18, %v2147_v2 }
  0xd3   : > { %1233 = vst [vmem:[%s2153_s22 + $0x240] sm:$0xff] %v1089_v16  ;;  %v1019_v21 = vmax.f32 %v651_v17, 0.0  ;;  %v1660_v16 = vld [vmem:[%s2118_s29 + $0x58] sm:$0xff]  ;;  %v1678_v17 = vld [vmem:[%s2118_s29 + $0xe8] sm:$0xff] }
  0xd4   : > { %1234 = vst [vmem:[%s2153_s22 + $0x248] sm:$0xff] %v1090_v19  ;;  %v1020_v22 = vmax.f32 %v840_v20, 0.0 }
  0xd5   : > { %1163 = vst [vmem:[%s2153_s22 + $0x10] sm:$0xff] %v1019_v21 }
  0xd6   : > { %1164 = vst [vmem:[%s2153_s22 + $0x18] sm:$0xff] %v1020_v22  ;;  %v740_v23 = vpop.f32.mrf.mxu2 }
  0xd7   : > { %v741_v24 = vadd.f32 %v740_v23, %v2144_v1  ;;  %v929_v25 = vpop.f32.mrf.mxu3 }
  0xd8   : > { %v930_v28 = vadd.f32 %v929_v25, %v2147_v2  ;;  %v653_v29 = vpop.f32.mrf.mxu0 }
  0xd9   : > { %v1091_v30 = vmax.f32 %v741_v24, 0.0  ;;  %v654_v31 = vadd.f32 %v653_v29, %v2144_v1  ;;  %v842_v32 = vpop.f32.mrf.mxu1 }
  0xda   : > { %v1092_v33 = vmax.f32 %v930_v28, 0.0  ;;  %v843_v34 = vadd.f32 %v842_v32, %v2147_v2 }
  0xdb   : > { %1235 = vst [vmem:[%s2153_s22 + $0x250] sm:$0xff] %v1091_v30  ;;  %v1021_v35 = vmax.f32 %v654_v31, 0.0  ;;  %692 = vmatmul.bf16.gmra.mxu0 %v1658_v26  ;;  %782 = vmatmul.bf16.gmra.mxu2 %v1676_v27 }
  0xdc   : > { %1236 = vst [vmem:[%s2153_s22 + $0x258] sm:$0xff] %v1092_v33  ;;  %v1022_v36 = vmax.f32 %v843_v34, 0.0  ;;  %881 = vmatmul.bf16.gmra.mxu1 %v1658_v26  ;;  %971 = vmatmul.bf16.gmra.mxu3 %v1676_v27 }
  0xdd   : > { %1165 = vst [vmem:[%s2153_s22 + $0x20] sm:$0xff] %v1021_v35 }
  0xde   : > { %1166 = vst [vmem:[%s2153_s22 + $0x28] sm:$0xff] %v1022_v36  ;;  %v743_v37 = vpop.f32.mrf.mxu2 }
  0xdf   : > { %v744_v38 = vadd.f32 %v743_v37, %v2144_v1  ;;  %v932_v39 = vpop.f32.mrf.mxu3 }
  0xe0   : > { %v933_v40 = vadd.f32 %v932_v39, %v2147_v2  ;;  %v655_v41 = vpop.f32.mrf.mxu0 }
  0xe1   : > { %v1093_v42 = vmax.f32 %v744_v38, 0.0  ;;  %v656_v43 = vadd.f32 %v655_v41, %v2144_v1  ;;  %v844_v44 = vpop.f32.mrf.mxu1 }
  0xe2   : > { %v1094_v45 = vmax.f32 %v933_v40, 0.0  ;;  %v845_v46 = vadd.f32 %v844_v44, %v2147_v2 }
  0xe3   : > { %1237 = vst [vmem:[%s2153_s22 + $0x260] sm:$0xff] %v1093_v42  ;;  %v1023_v47 = vmax.f32 %v656_v43, 0.0  ;;  %v1661_v42 = vld [vmem:[%s2118_s29 + $0x60] sm:$0xff]  ;;  %v1679_v43 = vld [vmem:[%s2118_s29 + $0xf0] sm:$0xff] }
  0xe4   : > { %1238 = vst [vmem:[%s2153_s22 + $0x268] sm:$0xff] %v1094_v45  ;;  %v1024_v48 = vmax.f32 %v845_v46, 0.0 }
  0xe5   : > { %1167 = vst [vmem:[%s2153_s22 + $0x30] sm:$0xff] %v1023_v47 }
  0xe6   : > { %1168 = vst [vmem:[%s2153_s22 + $0x38] sm:$0xff] %v1024_v48  ;;  %v745_v49 = vpop.f32.mrf.mxu2 }
  0xe7   : > { %v746_v50 = vadd.f32 %v745_v49, %v2144_v1  ;;  %v934_v51 = vpop.f32.mrf.mxu3 }
  0xe8   : > { %v935_v54 = vadd.f32 %v934_v51, %v2147_v2  ;;  %v658_v55 = vpop.f32.mrf.mxu0 }
  0xe9   : > { %v1095_v56 = vmax.f32 %v746_v50, 0.0  ;;  %v659_v57 = vadd.f32 %v658_v55, %v2144_v1  ;;  %v847_v58 = vpop.f32.mrf.mxu1 }
  0xea   : > { %v1096_v59 = vmax.f32 %v935_v54, 0.0  ;;  %v848_v60 = vadd.f32 %v847_v58, %v2147_v2 }
  0xeb   : > { %1239 = vst [vmem:[%s2153_s22 + $0x270] sm:$0xff] %v1095_v56  ;;  %v1025_v61 = vmax.f32 %v659_v57, 0.0  ;;  %697 = vmatmul.bf16.gmra.mxu0 %v1659_v52  ;;  %787 = vmatmul.bf16.gmra.mxu2 %v1677_v53 }
  0xec   : > { %1240 = vst [vmem:[%s2153_s22 + $0x278] sm:$0xff] %v1096_v59  ;;  %v1026_v62 = vmax.f32 %v848_v60, 0.0  ;;  %886 = vmatmul.bf16.gmra.mxu1 %v1659_v52  ;;  %976 = vmatmul.bf16.gmra.mxu3 %v1677_v53 }
  0xed   : > { %1169 = vst [vmem:[%s2153_s22 + $0x40] sm:$0xff] %v1025_v61 }
  0xee   : > { %1170 = vst [vmem:[%s2153_s22 + $0x48] sm:$0xff] %v1026_v62  ;;  %v748_v63 = vpop.f32.mrf.mxu2 }
  0xef   : > { %v749_v0 = vadd.f32 %v748_v63, %v2144_v1  ;;  %v937_v3 = vpop.f32.mrf.mxu3 }
  0xf0   : > { %v938_v4 = vadd.f32 %v937_v3, %v2147_v2  ;;  %v660_v5 = vpop.f32.mrf.mxu0 }
  0xf1   : > { %v1097_v6 = vmax.f32 %v749_v0, 0.0  ;;  %v661_v7 = vadd.f32 %v660_v5, %v2144_v1  ;;  %v849_v8 = vpop.f32.mrf.mxu1 }
  0xf2   : > { %v1098_v9 = vmax.f32 %v938_v4, 0.0  ;;  %v850_v10 = vadd.f32 %v849_v8, %v2147_v2 }
  0xf3   : > { %1241 = vst [vmem:[%s2153_s22 + $0x280] sm:$0xff] %v1097_v6  ;;  %v1027_v11 = vmax.f32 %v661_v7, 0.0  ;;  %v1662_v6 = vld [vmem:[%s2118_s29 + $0x68] sm:$0xff]  ;;  %v1680_v7 = vld [vmem:[%s2118_s29 + $0xf8] sm:$0xff] }
  0xf4   : > { %1242 = vst [vmem:[%s2153_s22 + $0x288] sm:$0xff] %v1098_v9  ;;  %v1028_v12 = vmax.f32 %v850_v10, 0.0 }
  0xf5   : > { %1171 = vst [vmem:[%s2153_s22 + $0x50] sm:$0xff] %v1027_v11 }
  0xf6   : > { %1172 = vst [vmem:[%s2153_s22 + $0x58] sm:$0xff] %v1028_v12  ;;  %v750_v13 = vpop.f32.mrf.mxu2 }
  0xf7   : > { %v751_v14 = vadd.f32 %v750_v13, %v2144_v1  ;;  %v939_v15 = vpop.f32.mrf.mxu3 }
  0xf8   : > { %v940_v18 = vadd.f32 %v939_v15, %v2147_v2  ;;  %v663_v19 = vpop.f32.mrf.mxu0 }
  0xf9   : > { %v1099_v20 = vmax.f32 %v751_v14, 0.0  ;;  %v664_v21 = vadd.f32 %v663_v19, %v2144_v1  ;;  %v852_v22 = vpop.f32.mrf.mxu1 }
  0xfa   : > { %v1100_v23 = vmax.f32 %v940_v18, 0.0  ;;  %v853_v24 = vadd.f32 %v852_v22, %v2147_v2 }
  0xfb   : > { %1243 = vst [vmem:[%s2153_s22 + $0x290] sm:$0xff] %v1099_v20  ;;  %v1029_v25 = vmax.f32 %v664_v21, 0.0  ;;  %702 = vmatmul.bf16.gmra.mxu0 %v1660_v16  ;;  %792 = vmatmul.bf16.gmra.mxu2 %v1678_v17 }
  0xfc   : > { %1244 = vst [vmem:[%s2153_s22 + $0x298] sm:$0xff] %v1100_v23  ;;  %v1030_v26 = vmax.f32 %v853_v24, 0.0  ;;  %891 = vmatmul.bf16.gmra.mxu1 %v1660_v16  ;;  %981 = vmatmul.bf16.gmra.mxu3 %v1678_v17 }
  0xfd   : > { %1173 = vst [vmem:[%s2153_s22 + $0x60] sm:$0xff] %v1029_v25 }
  0xfe   : > { %1174 = vst [vmem:[%s2153_s22 + $0x68] sm:$0xff] %v1030_v26  ;;  %v753_v27 = vpop.f32.mrf.mxu2 }
  0xff   : > { %v754_v28 = vadd.f32 %v753_v27, %v2144_v1  ;;  %v942_v29 = vpop.f32.mrf.mxu3 }
 0x100   : > { %v943_v30 = vadd.f32 %v942_v29, %v2147_v2  ;;  %v665_v31 = vpop.f32.mrf.mxu0 }
 0x101   : > { %v1101_v32 = vmax.f32 %v754_v28, 0.0  ;;  %v666_v33 = vadd.f32 %v665_v31, %v2144_v1  ;;  %v854_v34 = vpop.f32.mrf.mxu1 }
 0x102   : > { %v1102_v35 = vmax.f32 %v943_v30, 0.0  ;;  %v855_v36 = vadd.f32 %v854_v34, %v2147_v2 }
 0x103   : > { %1245 = vst [vmem:[%s2153_s22 + $0x2a0] sm:$0xff] %v1101_v32  ;;  %v1031_v37 = vmax.f32 %v666_v33, 0.0  ;;  %v1663_v32 = vld [vmem:[%s2118_s29 + $0x70] sm:$0xff]  ;;  %v1681_v33 = vld [vmem:[%s2118_s29 + $0x100] sm:$0xff] }
 0x104   : > { %1246 = vst [vmem:[%s2153_s22 + $0x2a8] sm:$0xff] %v1102_v35  ;;  %v1032_v38 = vmax.f32 %v855_v36, 0.0 }
 0x105   : > { %1175 = vst [vmem:[%s2153_s22 + $0x70] sm:$0xff] %v1031_v37 }
 0x106   : > { %1176 = vst [vmem:[%s2153_s22 + $0x78] sm:$0xff] %v1032_v38  ;;  %v755_v39 = vpop.f32.mrf.mxu2 }
 0x107   : > { %v756_v40 = vadd.f32 %v755_v39, %v2144_v1  ;;  %v944_v41 = vpop.f32.mrf.mxu3 }
 0x108   : > { %v945_v44 = vadd.f32 %v944_v41, %v2147_v2  ;;  %v668_v45 = vpop.f32.mrf.mxu0 }
 0x109   : > { %v1103_v46 = vmax.f32 %v756_v40, 0.0  ;;  %v669_v47 = vadd.f32 %v668_v45, %v2144_v1  ;;  %v857_v48 = vpop.f32.mrf.mxu1 }
 0x10a   : > { %v1104_v49 = vmax.f32 %v945_v44, 0.0  ;;  %v858_v50 = vadd.f32 %v857_v48, %v2147_v2 }
 0x10b   : > { %1247 = vst [vmem:[%s2153_s22 + $0x2b0] sm:$0xff] %v1103_v46  ;;  %v1033_v51 = vmax.f32 %v669_v47, 0.0  ;;  %707 = vmatmul.bf16.gmra.mxu0 %v1661_v42  ;;  %797 = vmatmul.bf16.gmra.mxu2 %v1679_v43 }
 0x10c   : > { %1248 = vst [vmem:[%s2153_s22 + $0x2b8] sm:$0xff] %v1104_v49  ;;  %v1034_v52 = vmax.f32 %v858_v50, 0.0  ;;  %896 = vmatmul.bf16.gmra.mxu1 %v1661_v42  ;;  %986 = vmatmul.bf16.gmra.mxu3 %v1679_v43 }
 0x10d   : > { %1177 = vst [vmem:[%s2153_s22 + $0x80] sm:$0xff] %v1033_v51 }
 0x10e   : > { %1178 = vst [vmem:[%s2153_s22 + $0x88] sm:$0xff] %v1034_v52  ;;  %v758_v53 = vpop.f32.mrf.mxu2 }
 0x10f   : > { %v759_v54 = vadd.f32 %v758_v53, %v2144_v1  ;;  %v947_v55 = vpop.f32.mrf.mxu3 }
 0x110   : > { %v948_v56 = vadd.f32 %v947_v55, %v2147_v2  ;;  %v670_v57 = vpop.f32.mrf.mxu0 }
 0x111   : > { %v1105_v58 = vmax.f32 %v759_v54, 0.0  ;;  %v671_v59 = vadd.f32 %v670_v57, %v2144_v1  ;;  %v859_v60 = vpop.f32.mrf.mxu1 }
 0x112   : > { %v1106_v61 = vmax.f32 %v948_v56, 0.0  ;;  %v860_v62 = vadd.f32 %v859_v60, %v2147_v2 }
 0x113   : > { %1249 = vst [vmem:[%s2153_s22 + $0x2c0] sm:$0xff] %v1105_v58  ;;  %v1035_v63 = vmax.f32 %v671_v59, 0.0  ;;  %v1664_v58 = vld [vmem:[%s2118_s29 + $0x78] sm:$0xff]  ;;  %v1682_v59 = vld [vmem:[%s2118_s29 + $0x108] sm:$0xff] }
 0x114   : > { %1250 = vst [vmem:[%s2153_s22 + $0x2c8] sm:$0xff] %v1106_v61  ;;  %v1036_v0 = vmax.f32 %v860_v62, 0.0 }
 0x115   : > { %1179 = vst [vmem:[%s2153_s22 + $0x90] sm:$0xff] %v1035_v63 }
 0x116   : > { %1180 = vst [vmem:[%s2153_s22 + $0x98] sm:$0xff] %v1036_v0  ;;  %v760_v3 = vpop.f32.mrf.mxu2 }
 0x117   : > { %v761_v4 = vadd.f32 %v760_v3, %v2144_v1  ;;  %v949_v5 = vpop.f32.mrf.mxu3 }
 0x118   : > { %v950_v8 = vadd.f32 %v949_v5, %v2147_v2  ;;  %v673_v9 = vpop.f32.mrf.mxu0 }
 0x119   : > { %v1107_v10 = vmax.f32 %v761_v4, 0.0  ;;  %v674_v11 = vadd.f32 %v673_v9, %v2144_v1  ;;  %v862_v12 = vpop.f32.mrf.mxu1 }
 0x11a   : > { %v1108_v13 = vmax.f32 %v950_v8, 0.0  ;;  %v863_v14 = vadd.f32 %v862_v12, %v2147_v2 }
 0x11b   : > { %1251 = vst [vmem:[%s2153_s22 + $0x2d0] sm:$0xff] %v1107_v10  ;;  %v1037_v15 = vmax.f32 %v674_v11, 0.0  ;;  %712 = vmatmul.bf16.gmra.mxu0 %v1662_v6  ;;  %802 = vmatmul.bf16.gmra.mxu2 %v1680_v7 }
 0x11c   : > { %1252 = vst [vmem:[%s2153_s22 + $0x2d8] sm:$0xff] %v1108_v13  ;;  %v1038_v16 = vmax.f32 %v863_v14, 0.0  ;;  %901 = vmatmul.bf16.gmra.mxu1 %v1662_v6  ;;  %991 = vmatmul.bf16.gmra.mxu3 %v1680_v7 }
 0x11d   : > { %1181 = vst [vmem:[%s2153_s22 + $0xa0] sm:$0xff] %v1037_v15 }
 0x11e   : > { %1182 = vst [vmem:[%s2153_s22 + $0xa8] sm:$0xff] %v1038_v16  ;;  %v763_v17 = vpop.f32.mrf.mxu2 }
 0x11f   : > { %v764_v18 = vadd.f32 %v763_v17, %v2144_v1  ;;  %v952_v19 = vpop.f32.mrf.mxu3 }
 0x120   : > { %v953_v20 = vadd.f32 %v952_v19, %v2147_v2  ;;  %v675_v21 = vpop.f32.mrf.mxu0 }
 0x121   : > { %v1109_v22 = vmax.f32 %v764_v18, 0.0  ;;  %v676_v23 = vadd.f32 %v675_v21, %v2144_v1  ;;  %v864_v24 = vpop.f32.mrf.mxu1 }
 0x122   : > { %v1110_v25 = vmax.f32 %v953_v20, 0.0  ;;  %v865_v26 = vadd.f32 %v864_v24, %v2147_v2 }
 0x123   : > { %1253 = vst [vmem:[%s2153_s22 + $0x2e0] sm:$0xff] %v1109_v22  ;;  %v1039_v27 = vmax.f32 %v676_v23, 0.0  ;;  %v1665_v22 = vld [vmem:[%s2118_s29 + $0x80] sm:$0xff]  ;;  %v1683_v23 = vld [vmem:[%s2118_s29 + $0x110] sm:$0xff] }
 0x124   : > { %1254 = vst [vmem:[%s2153_s22 + $0x2e8] sm:$0xff] %v1110_v25  ;;  %v1040_v28 = vmax.f32 %v865_v26, 0.0 }
 0x125   : > { %1183 = vst [vmem:[%s2153_s22 + $0xb0] sm:$0xff] %v1039_v27 }
 0x126   : > { %1184 = vst [vmem:[%s2153_s22 + $0xb8] sm:$0xff] %v1040_v28  ;;  %v765_v29 = vpop.f32.mrf.mxu2 }
 0x127   : > { %v766_v30 = vadd.f32 %v765_v29, %v2144_v1  ;;  %v954_v31 = vpop.f32.mrf.mxu3 }
 0x128   : > { %v955_v34 = vadd.f32 %v954_v31, %v2147_v2  ;;  %v678_v35 = vpop.f32.mrf.mxu0 }
 0x129   : > { %v1111_v36 = vmax.f32 %v766_v30, 0.0  ;;  %v679_v37 = vadd.f32 %v678_v35, %v2144_v1  ;;  %v867_v38 = vpop.f32.mrf.mxu1 }
 0x12a   : > { %v1112_v39 = vmax.f32 %v955_v34, 0.0  ;;  %v868_v40 = vadd.f32 %v867_v38, %v2147_v2 }
 0x12b   : > { %1255 = vst [vmem:[%s2153_s22 + $0x2f0] sm:$0xff] %v1111_v36  ;;  %v1041_v41 = vmax.f32 %v679_v37, 0.0  ;;  %717 = vmatmul.bf16.gmra.mxu0 %v1663_v32  ;;  %807 = vmatmul.bf16.gmra.mxu2 %v1681_v33 }
 0x12c   : > { %1256 = vst [vmem:[%s2153_s22 + $0x2f8] sm:$0xff] %v1112_v39  ;;  %v1042_v42 = vmax.f32 %v868_v40, 0.0  ;;  %906 = vmatmul.bf16.gmra.mxu1 %v1663_v32  ;;  %996 = vmatmul.bf16.gmra.mxu3 %v1681_v33 }
 0x12d   : > { %1185 = vst [vmem:[%s2153_s22 + $0xc0] sm:$0xff] %v1041_v41 }
 0x12e   : > { %1186 = vst [vmem:[%s2153_s22 + $0xc8] sm:$0xff] %v1042_v42  ;;  %v768_v43 = vpop.f32.mrf.mxu2 }
 0x12f   : > { %v769_v44 = vadd.f32 %v768_v43, %v2144_v1  ;;  %v957_v45 = vpop.f32.mrf.mxu3 }
 0x130   : > { %v958_v46 = vadd.f32 %v957_v45, %v2147_v2  ;;  %v680_v47 = vpop.f32.mrf.mxu0 }
 0x131   : > { %v1113_v48 = vmax.f32 %v769_v44, 0.0  ;;  %v681_v49 = vadd.f32 %v680_v47, %v2144_v1  ;;  %v869_v50 = vpop.f32.mrf.mxu1 }
 0x132   : > { %v1114_v51 = vmax.f32 %v958_v46, 0.0  ;;  %v870_v52 = vadd.f32 %v869_v50, %v2147_v2 }
 0x133   : > { %1257 = vst [vmem:[%s2153_s22 + $0x300] sm:$0xff] %v1113_v48  ;;  %v1043_v53 = vmax.f32 %v681_v49, 0.0  ;;  %v1666_v48 = vld [vmem:[%s2118_s29 + $0x88] sm:$0xff]  ;;  %v1684_v49 = vld [vmem:[%s2118_s29 + $0x118] sm:$0xff] }
 0x134   : > { %1258 = vst [vmem:[%s2153_s22 + $0x308] sm:$0xff] %v1114_v51  ;;  %v1044_v54 = vmax.f32 %v870_v52, 0.0 }
 0x135   : > { %1187 = vst [vmem:[%s2153_s22 + $0xd0] sm:$0xff] %v1043_v53 }
 0x136   : > { %1188 = vst [vmem:[%s2153_s22 + $0xd8] sm:$0xff] %v1044_v54  ;;  %v770_v55 = vpop.f32.mrf.mxu2 }
 0x137   : > { %v771_v56 = vadd.f32 %v770_v55, %v2144_v1  ;;  %v959_v57 = vpop.f32.mrf.mxu3 }
 0x138   : > { %v960_v60 = vadd.f32 %v959_v57, %v2147_v2  ;;  %v683_v61 = vpop.f32.mrf.mxu0 }
 0x139   : > { %v1115_v62 = vmax.f32 %v771_v56, 0.0  ;;  %v684_v63 = vadd.f32 %v683_v61, %v2144_v1  ;;  %v872_v0 = vpop.f32.mrf.mxu1 }
 0x13a   : > { %v1116_v3 = vmax.f32 %v960_v60, 0.0  ;;  %v873_v4 = vadd.f32 %v872_v0, %v2147_v2 }
 0x13b   : > { %1259 = vst [vmem:[%s2153_s22 + $0x310] sm:$0xff] %v1115_v62  ;;  %v1045_v5 = vmax.f32 %v684_v63, 0.0  ;;  %722 = vmatmul.bf16.gmra.mxu0 %v1664_v58  ;;  %812 = vmatmul.bf16.gmra.mxu2 %v1682_v59 }
 0x13c   : > { %1260 = vst [vmem:[%s2153_s22 + $0x318] sm:$0xff] %v1116_v3  ;;  %v1046_v6 = vmax.f32 %v873_v4, 0.0  ;;  %911 = vmatmul.bf16.gmra.mxu1 %v1664_v58  ;;  %1001 = vmatmul.bf16.gmra.mxu3 %v1682_v59 }
 0x13d   : > { %1189 = vst [vmem:[%s2153_s22 + $0xe0] sm:$0xff] %v1045_v5 }
 0x13e   : > { %1190 = vst [vmem:[%s2153_s22 + $0xe8] sm:$0xff] %v1046_v6  ;;  %v773_v7 = vpop.f32.mrf.mxu2 }
 0x13f   : > { %v774_v8 = vadd.f32 %v773_v7, %v2144_v1  ;;  %v962_v9 = vpop.f32.mrf.mxu3 }
 0x140   : > { %v963_v10 = vadd.f32 %v962_v9, %v2147_v2  ;;  %v685_v11 = vpop.f32.mrf.mxu0 }
 0x141   : > { %v1117_v12 = vmax.f32 %v774_v8, 0.0  ;;  %v686_v13 = vadd.f32 %v685_v11, %v2144_v1  ;;  %v874_v14 = vpop.f32.mrf.mxu1 }
 0x142   : > { %v1118_v15 = vmax.f32 %v963_v10, 0.0  ;;  %v875_v16 = vadd.f32 %v874_v14, %v2147_v2 }
 0x143   : > { %1261 = vst [vmem:[%s2153_s22 + $0x320] sm:$0xff] %v1117_v12  ;;  %v1047_v17 = vmax.f32 %v686_v13, 0.0 }
 0x144   : > { %1262 = vst [vmem:[%s2153_s22 + $0x328] sm:$0xff] %v1118_v15  ;;  %v1048_v18 = vmax.f32 %v875_v16, 0.0 }
 0x145   : > { %1191 = vst [vmem:[%s2153_s22 + $0xf0] sm:$0xff] %v1047_v17 }
 0x146   : > { %1192 = vst [vmem:[%s2153_s22 + $0xf8] sm:$0xff] %v1048_v18  ;;  %v775_v19 = vpop.f32.mrf.mxu2 }
 0x147   : > { %v776_v20 = vadd.f32 %v775_v19, %v2144_v1  ;;  %v964_v21 = vpop.f32.mrf.mxu3 }
 0x148   : > { %v965_v24 = vadd.f32 %v964_v21, %v2147_v2  ;;  %v688_v25 = vpop.f32.mrf.mxu0 }
 0x149   : > { %v1119_v26 = vmax.f32 %v776_v20, 0.0  ;;  %v689_v27 = vadd.f32 %v688_v25, %v2144_v1  ;;  %v877_v28 = vpop.f32.mrf.mxu1 }
 0x14a   : > { %v1120_v29 = vmax.f32 %v965_v24, 0.0  ;;  %v878_v30 = vadd.f32 %v877_v28, %v2147_v2 }
 0x14b   : > { %1263 = vst [vmem:[%s2153_s22 + $0x330] sm:$0xff] %v1119_v26  ;;  %v1049_v31 = vmax.f32 %v689_v27, 0.0  ;;  %727 = vmatmul.bf16.gmra.mxu0 %v1665_v22  ;;  %817 = vmatmul.bf16.gmra.mxu2 %v1683_v23 }
 0x14c   : > { %1264 = vst [vmem:[%s2153_s22 + $0x338] sm:$0xff] %v1120_v29  ;;  %v1050_v32 = vmax.f32 %v878_v30, 0.0  ;;  %916 = vmatmul.bf16.gmra.mxu1 %v1665_v22  ;;  %1006 = vmatmul.bf16.gmra.mxu3 %v1683_v23 }
 0x14d   : > { %1193 = vst [vmem:[%s2153_s22 + $0x100] sm:$0xff] %v1049_v31 }
 0x14e   : > { %1194 = vst [vmem:[%s2153_s22 + $0x108] sm:$0xff] %v1050_v32  ;;  %v778_v33 = vpop.f32.mrf.mxu2 }
 0x14f   : > { %v779_v34 = vadd.f32 %v778_v33, %v2144_v1  ;;  %v967_v35 = vpop.f32.mrf.mxu3 }
 0x150   : > { %v968_v36 = vadd.f32 %v967_v35, %v2147_v2  ;;  %v690_v37 = vpop.f32.mrf.mxu0 }
 0x151   : > { %v1121_v38 = vmax.f32 %v779_v34, 0.0  ;;  %v691_v39 = vadd.f32 %v690_v37, %v2144_v1  ;;  %v879_v40 = vpop.f32.mrf.mxu1 }
 0x152   : > { %v1122_v41 = vmax.f32 %v968_v36, 0.0  ;;  %v880_v42 = vadd.f32 %v879_v40, %v2147_v2 }
 0x153   : > { %1265 = vst [vmem:[%s2153_s22 + $0x340] sm:$0xff] %v1121_v38  ;;  %v1051_v43 = vmax.f32 %v691_v39, 0.0 }
 0x154   : > { %1266 = vst [vmem:[%s2153_s22 + $0x348] sm:$0xff] %v1122_v41  ;;  %v1052_v44 = vmax.f32 %v880_v42, 0.0 }
 0x155   : > { %1195 = vst [vmem:[%s2153_s22 + $0x110] sm:$0xff] %v1051_v43 }
 0x156   : > { %1196 = vst [vmem:[%s2153_s22 + $0x118] sm:$0xff] %v1052_v44  ;;  %v780_v45 = vpop.f32.mrf.mxu2 }
 0x157   : > { %v781_v46 = vadd.f32 %v780_v45, %v2144_v1  ;;  %v969_v47 = vpop.f32.mrf.mxu3 }
 0x158   : > { %v970_v50 = vadd.f32 %v969_v47, %v2147_v2  ;;  %v693_v51 = vpop.f32.mrf.mxu0 }
 0x159   : > { %v1123_v52 = vmax.f32 %v781_v46, 0.0  ;;  %v694_v53 = vadd.f32 %v693_v51, %v2144_v1  ;;  %v882_v54 = vpop.f32.mrf.mxu1 }
 0x15a   : > { %v1124_v55 = vmax.f32 %v970_v50, 0.0  ;;  %v883_v56 = vadd.f32 %v882_v54, %v2147_v2 }
 0x15b   : > { %1267 = vst [vmem:[%s2153_s22 + $0x350] sm:$0xff] %v1123_v52  ;;  %v1053_v57 = vmax.f32 %v694_v53, 0.0  ;;  %732 = vmatmul.bf16.gmra.mxu0 %v1666_v48  ;;  %822 = vmatmul.bf16.gmra.mxu2 %v1684_v49 }
 0x15c   : > { %1268 = vst [vmem:[%s2153_s22 + $0x358] sm:$0xff] %v1124_v55  ;;  %v1054_v58 = vmax.f32 %v883_v56, 0.0  ;;  %921 = vmatmul.bf16.gmra.mxu1 %v1666_v48  ;;  %1011 = vmatmul.bf16.gmra.mxu3 %v1684_v49 }
 0x15d   : > { %1197 = vst [vmem:[%s2153_s22 + $0x120] sm:$0xff] %v1053_v57 }
 0x15e   : > { %1198 = vst [vmem:[%s2153_s22 + $0x128] sm:$0xff] %v1054_v58  ;;  %v783_v59 = vpop.f32.mrf.mxu2 }
 0x15f   : > { %v784_v60 = vadd.f32 %v783_v59, %v2144_v1  ;;  %v972_v61 = vpop.f32.mrf.mxu3 }
 0x160   : > { %v973_v62 = vadd.f32 %v972_v61, %v2147_v2  ;;  %v695_v63 = vpop.f32.mrf.mxu0 }
 0x161   : > { %v1125_v0 = vmax.f32 %v784_v60, 0.0  ;;  %v696_v3 = vadd.f32 %v695_v63, %v2144_v1  ;;  %v884_v4 = vpop.f32.mrf.mxu1 }
 0x162   : > { %v1126_v5 = vmax.f32 %v973_v62, 0.0  ;;  %v885_v6 = vadd.f32 %v884_v4, %v2147_v2 }
 0x163   : > { %1269 = vst [vmem:[%s2153_s22 + $0x360] sm:$0xff] %v1125_v0  ;;  %v1055_v7 = vmax.f32 %v696_v3, 0.0 }
 0x164   : > { %1270 = vst [vmem:[%s2153_s22 + $0x368] sm:$0xff] %v1126_v5  ;;  %v1056_v8 = vmax.f32 %v885_v6, 0.0 }
 0x165   : > { %1199 = vst [vmem:[%s2153_s22 + $0x130] sm:$0xff] %v1055_v7 }
 0x166   : > { %1200 = vst [vmem:[%s2153_s22 + $0x138] sm:$0xff] %v1056_v8  ;;  %v785_v9 = vpop.f32.mrf.mxu2 }
 0x167   : > { %v786_v10 = vadd.f32 %v785_v9, %v2144_v1  ;;  %v974_v11 = vpop.f32.mrf.mxu3 }
 0x168   : > { %v975_v12 = vadd.f32 %v974_v11, %v2147_v2  ;;  %v698_v13 = vpop.f32.mrf.mxu0 }
 0x169   : > { %v1127_v14 = vmax.f32 %v786_v10, 0.0  ;;  %v699_v15 = vadd.f32 %v698_v13, %v2144_v1  ;;  %v887_v16 = vpop.f32.mrf.mxu1 }
 0x16a   : > { %v1128_v17 = vmax.f32 %v975_v12, 0.0  ;;  %v888_v18 = vadd.f32 %v887_v16, %v2147_v2 }
 0x16b   : > { %1271 = vst [vmem:[%s2153_s22 + $0x370] sm:$0xff] %v1127_v14  ;;  %v1057_v19 = vmax.f32 %v699_v15, 0.0 }
 0x16c   : > { %1272 = vst [vmem:[%s2153_s22 + $0x378] sm:$0xff] %v1128_v17  ;;  %v1058_v20 = vmax.f32 %v888_v18, 0.0 }
 0x16d   : > { %1201 = vst [vmem:[%s2153_s22 + $0x140] sm:$0xff] %v1057_v19 }
 0x16e   : > { %1202 = vst [vmem:[%s2153_s22 + $0x148] sm:$0xff] %v1058_v20  ;;  %v788_v21 = vpop.f32.mrf.mxu2 }
 0x16f   : > { %v789_v22 = vadd.f32 %v788_v21, %v2144_v1  ;;  %v977_v23 = vpop.f32.mrf.mxu3 }
 0x170   : > { %v978_v24 = vadd.f32 %v977_v23, %v2147_v2  ;;  %v700_v25 = vpop.f32.mrf.mxu0 }
 0x171   : > { %v1129_v26 = vmax.f32 %v789_v22, 0.0  ;;  %v701_v27 = vadd.f32 %v700_v25, %v2144_v1  ;;  %v889_v28 = vpop.f32.mrf.mxu1 }
 0x172   : > { %v1130_v29 = vmax.f32 %v978_v24, 0.0  ;;  %v890_v30 = vadd.f32 %v889_v28, %v2147_v2 }
 0x173   : > { %1273 = vst [vmem:[%s2153_s22 + $0x380] sm:$0xff] %v1129_v26  ;;  %v1059_v31 = vmax.f32 %v701_v27, 0.0 }
 0x174   : > { %1274 = vst [vmem:[%s2153_s22 + $0x388] sm:$0xff] %v1130_v29  ;;  %v1060_v32 = vmax.f32 %v890_v30, 0.0 }
 0x175   : > { %1203 = vst [vmem:[%s2153_s22 + $0x150] sm:$0xff] %v1059_v31 }
 0x176   : > { %1204 = vst [vmem:[%s2153_s22 + $0x158] sm:$0xff] %v1060_v32  ;;  %v790_v33 = vpop.f32.mrf.mxu2 }
 0x177   : > { %v791_v34 = vadd.f32 %v790_v33, %v2144_v1  ;;  %v979_v35 = vpop.f32.mrf.mxu3 }
 0x178   : > { %v980_v36 = vadd.f32 %v979_v35, %v2147_v2  ;;  %v703_v37 = vpop.f32.mrf.mxu0 }
 0x179   : > { %v1131_v38 = vmax.f32 %v791_v34, 0.0  ;;  %v704_v39 = vadd.f32 %v703_v37, %v2144_v1  ;;  %v892_v40 = vpop.f32.mrf.mxu1 }
 0x17a   : > { %v1132_v41 = vmax.f32 %v980_v36, 0.0  ;;  %v893_v42 = vadd.f32 %v892_v40, %v2147_v2 }
 0x17b   : > { %1275 = vst [vmem:[%s2153_s22 + $0x390] sm:$0xff] %v1131_v38  ;;  %v1061_v43 = vmax.f32 %v704_v39, 0.0 }
 0x17c   : > { %1276 = vst [vmem:[%s2153_s22 + $0x398] sm:$0xff] %v1132_v41  ;;  %v1062_v44 = vmax.f32 %v893_v42, 0.0 }
 0x17d   : > { %1205 = vst [vmem:[%s2153_s22 + $0x160] sm:$0xff] %v1061_v43 }
 0x17e   : > { %1206 = vst [vmem:[%s2153_s22 + $0x168] sm:$0xff] %v1062_v44  ;;  %v793_v45 = vpop.f32.mrf.mxu2 }
 0x17f   : > { %v794_v46 = vadd.f32 %v793_v45, %v2144_v1  ;;  %v982_v47 = vpop.f32.mrf.mxu3 }
 0x180   : > { %v983_v48 = vadd.f32 %v982_v47, %v2147_v2  ;;  %v705_v49 = vpop.f32.mrf.mxu0 }
 0x181   : > { %v1133_v50 = vmax.f32 %v794_v46, 0.0  ;;  %v706_v51 = vadd.f32 %v705_v49, %v2144_v1  ;;  %v894_v52 = vpop.f32.mrf.mxu1 }
 0x182   : > { %v1134_v53 = vmax.f32 %v983_v48, 0.0  ;;  %v895_v54 = vadd.f32 %v894_v52, %v2147_v2 }
 0x183   : > { %1277 = vst [vmem:[%s2153_s22 + $0x3a0] sm:$0xff] %v1133_v50  ;;  %v1063_v55 = vmax.f32 %v706_v51, 0.0 }
 0x184   : > { %1278 = vst [vmem:[%s2153_s22 + $0x3a8] sm:$0xff] %v1134_v53  ;;  %v1064_v56 = vmax.f32 %v895_v54, 0.0 }
 0x185   : > { %1207 = vst [vmem:[%s2153_s22 + $0x170] sm:$0xff] %v1063_v55 }
 0x186   : > { %1208 = vst [vmem:[%s2153_s22 + $0x178] sm:$0xff] %v1064_v56  ;;  %v795_v57 = vpop.f32.mrf.mxu2 }
 0x187   : > { %v796_v58 = vadd.f32 %v795_v57, %v2144_v1  ;;  %v984_v59 = vpop.f32.mrf.mxu3 }
 0x188   : > { %v985_v60 = vadd.f32 %v984_v59, %v2147_v2  ;;  %v708_v61 = vpop.f32.mrf.mxu0 }
 0x189   : > { %v1135_v62 = vmax.f32 %v796_v58, 0.0  ;;  %v709_v63 = vadd.f32 %v708_v61, %v2144_v1  ;;  %v897_v0 = vpop.f32.mrf.mxu1 }
 0x18a   : > { %v1136_v3 = vmax.f32 %v985_v60, 0.0  ;;  %v898_v4 = vadd.f32 %v897_v0, %v2147_v2 }
 0x18b   : > { %1279 = vst [vmem:[%s2153_s22 + $0x3b0] sm:$0xff] %v1135_v62  ;;  %v1065_v5 = vmax.f32 %v709_v63, 0.0 }
 0x18c   : > { %1280 = vst [vmem:[%s2153_s22 + $0x3b8] sm:$0xff] %v1136_v3  ;;  %v1066_v6 = vmax.f32 %v898_v4, 0.0 }
 0x18d   : > { %1209 = vst [vmem:[%s2153_s22 + $0x180] sm:$0xff] %v1065_v5 }
 0x18e   : > { %1210 = vst [vmem:[%s2153_s22 + $0x188] sm:$0xff] %v1066_v6  ;;  %v798_v7 = vpop.f32.mrf.mxu2 }
 0x18f   : > { %v799_v8 = vadd.f32 %v798_v7, %v2144_v1  ;;  %v987_v9 = vpop.f32.mrf.mxu3 }
 0x190   : > { %v988_v10 = vadd.f32 %v987_v9, %v2147_v2  ;;  %v710_v11 = vpop.f32.mrf.mxu0 }
 0x191   : > { %v1137_v12 = vmax.f32 %v799_v8, 0.0  ;;  %v711_v13 = vadd.f32 %v710_v11, %v2144_v1  ;;  %v899_v14 = vpop.f32.mrf.mxu1 }
 0x192   : > { %v1138_v15 = vmax.f32 %v988_v10, 0.0  ;;  %v900_v16 = vadd.f32 %v899_v14, %v2147_v2 }
 0x193   : > { %1281 = vst [vmem:[%s2153_s22 + $0x3c0] sm:$0xff] %v1137_v12  ;;  %v1067_v17 = vmax.f32 %v711_v13, 0.0 }
 0x194   : > { %1282 = vst [vmem:[%s2153_s22 + $0x3c8] sm:$0xff] %v1138_v15  ;;  %v1068_v18 = vmax.f32 %v900_v16, 0.0 }
 0x195   : > { %1211 = vst [vmem:[%s2153_s22 + $0x190] sm:$0xff] %v1067_v17 }
 0x196   : > { %1212 = vst [vmem:[%s2153_s22 + $0x198] sm:$0xff] %v1068_v18  ;;  %v800_v19 = vpop.f32.mrf.mxu2 }
 0x197   : > { %v801_v20 = vadd.f32 %v800_v19, %v2144_v1  ;;  %v989_v21 = vpop.f32.mrf.mxu3 }
 0x198   : > { %v990_v22 = vadd.f32 %v989_v21, %v2147_v2  ;;  %v713_v23 = vpop.f32.mrf.mxu0 }
 0x199   : > { %v1139_v24 = vmax.f32 %v801_v20, 0.0  ;;  %v714_v25 = vadd.f32 %v713_v23, %v2144_v1  ;;  %v902_v26 = vpop.f32.mrf.mxu1 }
 0x19a   : > { %v1140_v27 = vmax.f32 %v990_v22, 0.0  ;;  %v903_v28 = vadd.f32 %v902_v26, %v2147_v2 }
 0x19b   : > { %1283 = vst [vmem:[%s2153_s22 + $0x3d0] sm:$0xff] %v1139_v24  ;;  %v1069_v29 = vmax.f32 %v714_v25, 0.0 }
 0x19c   : > { %1284 = vst [vmem:[%s2153_s22 + $0x3d8] sm:$0xff] %v1140_v27  ;;  %v1070_v30 = vmax.f32 %v903_v28, 0.0 }
 0x19d   : > { %1213 = vst [vmem:[%s2153_s22 + $0x1a0] sm:$0xff] %v1069_v29 }
 0x19e   : > { %1214 = vst [vmem:[%s2153_s22 + $0x1a8] sm:$0xff] %v1070_v30  ;;  %v803_v31 = vpop.f32.mrf.mxu2 }
 0x19f   : > { %v804_v32 = vadd.f32 %v803_v31, %v2144_v1  ;;  %v992_v33 = vpop.f32.mrf.mxu3 }
 0x1a0   : > { %v993_v34 = vadd.f32 %v992_v33, %v2147_v2  ;;  %v715_v35 = vpop.f32.mrf.mxu0 }
 0x1a1   : > { %v1141_v36 = vmax.f32 %v804_v32, 0.0  ;;  %v716_v37 = vadd.f32 %v715_v35, %v2144_v1  ;;  %v904_v38 = vpop.f32.mrf.mxu1 }
 0x1a2   : > { %v1142_v39 = vmax.f32 %v993_v34, 0.0  ;;  %v905_v40 = vadd.f32 %v904_v38, %v2147_v2 }
 0x1a3   : > { %1285 = vst [vmem:[%s2153_s22 + $0x3e0] sm:$0xff] %v1141_v36  ;;  %v1071_v41 = vmax.f32 %v716_v37, 0.0 }
 0x1a4   : > { %1286 = vst [vmem:[%s2153_s22 + $0x3e8] sm:$0xff] %v1142_v39  ;;  %v1072_v42 = vmax.f32 %v905_v40, 0.0 }
 0x1a5   : > { %1215 = vst [vmem:[%s2153_s22 + $0x1b0] sm:$0xff] %v1071_v41 }
 0x1a6   : > { %1216 = vst [vmem:[%s2153_s22 + $0x1b8] sm:$0xff] %v1072_v42  ;;  %v805_v43 = vpop.f32.mrf.mxu2 }
 0x1a7   : > { %v806_v44 = vadd.f32 %v805_v43, %v2144_v1  ;;  %v994_v45 = vpop.f32.mrf.mxu3 }
 0x1a8   : > { %v995_v46 = vadd.f32 %v994_v45, %v2147_v2  ;;  %v718_v47 = vpop.f32.mrf.mxu0 }
 0x1a9   : > { %v1143_v48 = vmax.f32 %v806_v44, 0.0  ;;  %v719_v49 = vadd.f32 %v718_v47, %v2144_v1  ;;  %v907_v50 = vpop.f32.mrf.mxu1 }
 0x1aa   : > { %v1144_v51 = vmax.f32 %v995_v46, 0.0  ;;  %v908_v52 = vadd.f32 %v907_v50, %v2147_v2 }
 0x1ab   : > { %1287 = vst [vmem:[%s2153_s22 + $0x3f0] sm:$0xff] %v1143_v48  ;;  %v1073_v53 = vmax.f32 %v719_v49, 0.0 }
 0x1ac   : > { %1288 = vst [vmem:[%s2153_s22 + $0x3f8] sm:$0xff] %v1144_v51  ;;  %v1074_v54 = vmax.f32 %v908_v52, 0.0 }
 0x1ad   : > { %1217 = vst [vmem:[%s2153_s22 + $0x1c0] sm:$0xff] %v1073_v53 }
 0x1ae   : > { %1218 = vst [vmem:[%s2153_s22 + $0x1c8] sm:$0xff] %v1074_v54  ;;  %v808_v55 = vpop.f32.mrf.mxu2 }
 0x1af   : > { %v809_v56 = vadd.f32 %v808_v55, %v2144_v1  ;;  %v997_v57 = vpop.f32.mrf.mxu3 }
 0x1b0   : > { %v998_v58 = vadd.f32 %v997_v57, %v2147_v2  ;;  %v720_v59 = vpop.f32.mrf.mxu0 }
 0x1b1   : > { %v1145_v60 = vmax.f32 %v809_v56, 0.0  ;;  %v721_v61 = vadd.f32 %v720_v59, %v2144_v1  ;;  %v909_v62 = vpop.f32.mrf.mxu1 }
 0x1b2   : > { %v1146_v63 = vmax.f32 %v998_v58, 0.0  ;;  %v910_v0 = vadd.f32 %v909_v62, %v2147_v2 }
 0x1b3   : > { %1289 = vst [vmem:[%s2153_s22 + $0x400] sm:$0xff] %v1145_v60  ;;  %v1075_v3 = vmax.f32 %v721_v61, 0.0 }
 0x1b4   : > { %1290 = vst [vmem:[%s2153_s22 + $0x408] sm:$0xff] %v1146_v63  ;;  %v1076_v4 = vmax.f32 %v910_v0, 0.0 }
 0x1b5   : > { %1219 = vst [vmem:[%s2153_s22 + $0x1d0] sm:$0xff] %v1075_v3 }
 0x1b6   : > { %1220 = vst [vmem:[%s2153_s22 + $0x1d8] sm:$0xff] %v1076_v4  ;;  %v810_v5 = vpop.f32.mrf.mxu2 }
 0x1b7   : > { %v811_v6 = vadd.f32 %v810_v5, %v2144_v1  ;;  %v999_v7 = vpop.f32.mrf.mxu3 }
 0x1b8   : > { %v1000_v8 = vadd.f32 %v999_v7, %v2147_v2  ;;  %v723_v9 = vpop.f32.mrf.mxu0 }
 0x1b9   : > { %v1147_v10 = vmax.f32 %v811_v6, 0.0  ;;  %v724_v11 = vadd.f32 %v723_v9, %v2144_v1  ;;  %v912_v12 = vpop.f32.mrf.mxu1 }
 0x1ba   : > { %v1148_v13 = vmax.f32 %v1000_v8, 0.0  ;;  %v913_v14 = vadd.f32 %v912_v12, %v2147_v2 }
 0x1bb   : > { %1291 = vst [vmem:[%s2153_s22 + $0x410] sm:$0xff] %v1147_v10  ;;  %v1077_v15 = vmax.f32 %v724_v11, 0.0 }
 0x1bc   : > { %1292 = vst [vmem:[%s2153_s22 + $0x418] sm:$0xff] %v1148_v13  ;;  %v1078_v16 = vmax.f32 %v913_v14, 0.0 }
 0x1bd   : > { %1221 = vst [vmem:[%s2153_s22 + $0x1e0] sm:$0xff] %v1077_v15 }
 0x1be   : > { %1222 = vst [vmem:[%s2153_s22 + $0x1e8] sm:$0xff] %v1078_v16  ;;  %v813_v17 = vpop.f32.mrf.mxu2 }
 0x1bf   : > { %v814_v18 = vadd.f32 %v813_v17, %v2144_v1  ;;  %v1002_v19 = vpop.f32.mrf.mxu3 }
 0x1c0   : > { %v1003_v20 = vadd.f32 %v1002_v19, %v2147_v2  ;;  %v725_v21 = vpop.f32.mrf.mxu0 }
 0x1c1   : > { %v1149_v22 = vmax.f32 %v814_v18, 0.0  ;;  %v726_v23 = vadd.f32 %v725_v21, %v2144_v1  ;;  %v914_v24 = vpop.f32.mrf.mxu1 }
 0x1c2   : > { %v1150_v25 = vmax.f32 %v1003_v20, 0.0  ;;  %v915_v26 = vadd.f32 %v914_v24, %v2147_v2 }
 0x1c3   : > { %1293 = vst [vmem:[%s2153_s22 + $0x420] sm:$0xff] %v1149_v22  ;;  %v1079_v27 = vmax.f32 %v726_v23, 0.0 }
 0x1c4   : > { %1294 = vst [vmem:[%s2153_s22 + $0x428] sm:$0xff] %v1150_v25  ;;  %v1080_v28 = vmax.f32 %v915_v26, 0.0 }
 0x1c5   : > { %1223 = vst [vmem:[%s2153_s22 + $0x1f0] sm:$0xff] %v1079_v27 }
 0x1c6   : > { %1224 = vst [vmem:[%s2153_s22 + $0x1f8] sm:$0xff] %v1080_v28  ;;  %v815_v29 = vpop.f32.mrf.mxu2 }
 0x1c7   : > { %v816_v30 = vadd.f32 %v815_v29, %v2144_v1  ;;  %v1004_v31 = vpop.f32.mrf.mxu3 }
 0x1c8   : > { %v1005_v32 = vadd.f32 %v1004_v31, %v2147_v2  ;;  %v728_v33 = vpop.f32.mrf.mxu0 }
 0x1c9   : > { %v1151_v34 = vmax.f32 %v816_v30, 0.0  ;;  %v729_v35 = vadd.f32 %v728_v33, %v2144_v1  ;;  %v917_v36 = vpop.f32.mrf.mxu1 }
 0x1ca   : > { %v1152_v37 = vmax.f32 %v1005_v32, 0.0  ;;  %v918_v38 = vadd.f32 %v917_v36, %v2147_v2 }
 0x1cb   : > { %1295 = vst [vmem:[%s2153_s22 + $0x430] sm:$0xff] %v1151_v34  ;;  %v1081_v39 = vmax.f32 %v729_v35, 0.0 }
 0x1cc   : > { %1296 = vst [vmem:[%s2153_s22 + $0x438] sm:$0xff] %v1152_v37  ;;  %v1082_v40 = vmax.f32 %v918_v38, 0.0 }
 0x1cd   : > { %1225 = vst [vmem:[%s2153_s22 + $0x200] sm:$0xff] %v1081_v39 }
 0x1ce   : > { %1226 = vst [vmem:[%s2153_s22 + $0x208] sm:$0xff] %v1082_v40  ;;  %v818_v41 = vpop.f32.mrf.mxu2 }
 0x1cf   : > { %v819_v42 = vadd.f32 %v818_v41, %v2144_v1  ;;  %v1007_v43 = vpop.f32.mrf.mxu3 }
 0x1d0   : > { %v1008_v44 = vadd.f32 %v1007_v43, %v2147_v2  ;;  %v730_v45 = vpop.f32.mrf.mxu0 }
 0x1d1   : > { %v1153_v46 = vmax.f32 %v819_v42, 0.0  ;;  %v731_v47 = vadd.f32 %v730_v45, %v2144_v1  ;;  %v919_v48 = vpop.f32.mrf.mxu1 }
 0x1d2   : > { %v1154_v49 = vmax.f32 %v1008_v44, 0.0  ;;  %v920_v50 = vadd.f32 %v919_v48, %v2147_v2 }
 0x1d3   : > { %1297 = vst [vmem:[%s2153_s22 + $0x440] sm:$0xff] %v1153_v46  ;;  %v1083_v51 = vmax.f32 %v731_v47, 0.0 }
 0x1d4   : > { %1298 = vst [vmem:[%s2153_s22 + $0x448] sm:$0xff] %v1154_v49  ;;  %v1084_v52 = vmax.f32 %v920_v50, 0.0 }
 0x1d5   : > { %1227 = vst [vmem:[%s2153_s22 + $0x210] sm:$0xff] %v1083_v51 }
 0x1d6   : > { %1228 = vst [vmem:[%s2153_s22 + $0x218] sm:$0xff] %v1084_v52  ;;  %v820_v53 = vpop.f32.mrf.mxu2 }
 0x1d7   : > { %v821_v54 = vadd.f32 %v820_v53, %v2144_v1  ;;  %v1009_v55 = vpop.f32.mrf.mxu3 }
 0x1d8   : > { %v1010_v56 = vadd.f32 %v1009_v55, %v2147_v2  ;;  %v733_v57 = vpop.f32.mrf.mxu0 }
 0x1d9   : > { %v1155_v58 = vmax.f32 %v821_v54, 0.0  ;;  %v734_v59 = vadd.f32 %v733_v57, %v2144_v1  ;;  %v922_v60 = vpop.f32.mrf.mxu1 }
 0x1da   : > { %v1156_v61 = vmax.f32 %v1010_v56, 0.0  ;;  %v923_v62 = vadd.f32 %v922_v60, %v2147_v2 }
 0x1db   : > { %1299 = vst [vmem:[%s2153_s22 + $0x450] sm:$0xff] %v1155_v58  ;;  %v1085_v63 = vmax.f32 %v734_v59, 0.0 }
 0x1dc   : > { %1300 = vst [vmem:[%s2153_s22 + $0x458] sm:$0xff] %v1156_v61  ;;  %v1086_v0 = vmax.f32 %v923_v62, 0.0 }
 0x1dd   : > { %1229 = vst [vmem:[%s2153_s22 + $0x220] sm:$0xff] %v1085_v63 }
 0x1de   : > { %1230 = vst [vmem:[%s2153_s22 + $0x228] sm:$0xff] %v1086_v0  ;;  %v823_v3 = vpop.f32.mrf.mxu2 }
 0x1df   : > { %v824_v4 = vadd.f32 %v823_v3, %v2144_v1  ;;  %v1012_v5 = vpop.f32.mrf.mxu3 }
 0x1e0   : > { %v1013_v6 = vadd.f32 %v1012_v5, %v2147_v2  ;;  %v735_v7 = vpop.f32.mrf.mxu0 }
 0x1e1   : > { %v1157_v8 = vmax.f32 %v824_v4, 0.0  ;;  %v736_v9 = vadd.f32 %v735_v7, %v2144_v1  ;;  %v924_v10 = vpop.f32.mrf.mxu1 }
 0x1e2   : > { %v1158_v11 = vmax.f32 %v1013_v6, 0.0  ;;  %v925_v12 = vadd.f32 %v924_v10, %v2147_v2 }
 0x1e3   : > { %1301 = vst [vmem:[%s2153_s22 + $0x460] sm:$0xff] %v1157_v8  ;;  %v1087_v13 = vmax.f32 %v736_v9, 0.0 }
 0x1e4   : > { %1302 = vst [vmem:[%s2153_s22 + $0x468] sm:$0xff] %v1158_v11  ;;  %v1088_v14 = vmax.f32 %v925_v12, 0.0 }
 0x1e5   : > { %1231 = vst [vmem:[%s2153_s22 + $0x230] sm:$0xff] %v1087_v13 }
 0x1e6   : > { %1232 = vst [vmem:[%s2153_s22 + $0x238] sm:$0xff] %v1088_v14  ;;  %v825_v15 = vpop.f32.mrf.mxu2 }
 0x1e7   : > { %v826_v16 = vadd.f32 %v825_v15, %v2144_v1  ;;  %v1014_v17 = vpop.f32.mrf.mxu3 }
 0x1e8   : > { %v1015_v18 = vadd.f32 %v1014_v17, %v2147_v2 }
 0x1e9   : > { %v1159_v19 = vmax.f32 %v826_v16, 0.0 }
 0x1ea   : > { %v1160_v20 = vmax.f32 %v1015_v18, 0.0 }
 0x1eb   : > { %1303 = vst [vmem:[%s2153_s22 + $0x470] sm:$0xff] %v1159_v19 }
 0x1ec   : > { %1304 = vst [vmem:[%s2153_s22 + $0x478] sm:$0xff] %v1160_v20 }
 0x1ed   : > { %1929 = shalt.err (!%p1926_p0)
}
 0x1ee   : > { %s1996_s11 = smov 256   ;;  %s1997_s29 = smov 16  }
 0x1ef   : > { %1733 = dma.vmem_to_hbm [thread:$0]  (%p2097_p7), %s1320_s15, 18432, %s1322_s4, %s1306_s5, %s1996_s11, %s1996_s11, %s1997_s29  }
 0x1f0 PF: > { %s1336_s20 = sand.u32 1, %s1968_s12   ;;  %p1747_p3 = pnand %p1431_p11, %p2067_p6 }
 0x1f1   : > { %s1337_s22 = scalar_lea.sflag [#allocation4], %s1336_s20 }
 0x1f2   : > { %p1748_p5 = pneg %p1747_p3 }
 0x1f4   : > { %1963 = dma.done.wait (%p1748_p5), %s1337_s22, 18432  }
 0x1f5   : > { %1965 = vsyncadd (%p1748_p5), %s1337_s22, 4294948864  ;;  %s20_s17 = sadd.s32 1, %s1988_s17   ;;  %s2508_s12 = smov %s1972_s13 }
 0x1f6   : > { %p17_p9 = scmp.ge.s32.totalorder %s20_s17, 4   ;;  %s2509_s13 = smov %s1976_s14 }
 0x1f7   : > { %s2510_s14 = smov %s2105_s26  ;;  %s2511_s15 = smov %s1984_s16 }
 0x1f8   : > { %s2512_s16 = smov %s2514_s10  ;;  %19 = sbr.rel (!%p17_p9) target bundleno = 7 (0x7), region = 86 }
 0x1fd   :  { %1343 = vsyncpa [#allocation3], 1 }
 0x1fe   :  { %1345 = vsyncpa [#allocation3 + $0x1], 1 }
 0x1ff   :  { %1346 = vsyncpa [#allocation6], 1 }
 0x200   :  { %1347 = vsyncpa [#allocation4], 1 }
 0x201   :  { %1349 = vsyncpa [#allocation4 + $0x1], 1 }

</bundles_post_ra>
